<compile_context>
chip_gen: v5e
topology: v5e:2x2
jax: 0.10.0
libtpu: 0.0.40
codegen_flags: <defaults>
</compile_context>

<pallas_src>
import math
import random
from functools import partial

import numpy as np
import jax
import jax.numpy as jnp
from jax.experimental import pallas as pl
from jax.experimental.pallas import tpu as pltpu


# ----------------------------------------------------------------------------- #
# Host-side: PyTorch-exact bicubic interpolation matrix (align_corners=False)
# ----------------------------------------------------------------------------- #
def _bicubic_matrix(in_size: int, out_size: int) -> np.ndarray:
    """M (out_size, in_size) s.t. y = M @ x matches F.interpolate(mode='bicubic',
    align_corners=False) along one axis (A = -0.75, border replication)."""
    A = -0.75

    def w1(x):  # |x| <= 1
        return ((A + 2.0) * x - (A + 3.0)) * x * x + 1.0

    def w2(x):  # 1 < |x| < 2
        return (((x - 5.0) * x + 8.0) * x - 4.0) * A

    mat = np.zeros((out_size, in_size), dtype=np.float32)
    scale = in_size / out_size
    for i in range(out_size):
        src = scale * (i + 0.5) - 0.5
        i0 = math.floor(src)
        t = src - i0
        coeffs = (w2(t + 1.0), w1(t), w1(1.0 - t), w2(2.0 - t))
        for k in range(4):
            idx = min(max(i0 - 1 + k, 0), in_size - 1)  # border replication
            mat[i, idx] += coeffs[k]
    return mat


# ----------------------------------------------------------------------------- #
# Pallas kernel: one batch row per grid step, all frames produced in the body
# ----------------------------------------------------------------------------- #
def _video_kernel(act_ref, src_ref, x_ref, m_ref, out_ref):
    # act_ref : SMEM (B,)            int32  -- 1 if batch row gets the shift transform
    # src_ref : SMEM (B, F)          int32  -- source frame index per output frame
    # x_ref   : VMEM (1, C, H*W)     f32    -- image, lane-dense
    # m_ref   : VMEM (S, H*W, H*W)   bf16   -- batch-shared kron(Wh_s, Ww_s)^T stack
    # out_ref : VMEM (1, C, F*H*W)   f32    -- all frames for this batch row
    b = pl.program_id(0)
    C, HW = x_ref.shape[1], x_ref.shape[2]
    F = out_ref.shape[2] // HW

    @pl.when(act_ref[b] == 0)
    def _inactive():
        # background not transformed: replicate the (exact f32) image per frame
        img = x_ref[0]                                            # (C, HW)
        for f in range(F):
            out_ref[0, :, f * HW:(f + 1) * HW] = img

    @pl.when(act_ref[b] != 0)
    def _active():
        x = x_ref[0].astype(jnp.bfloat16)                         # (C, HW)
        for f in range(F):
            s = src_ref[b, f]                                     # dynamic slab select
            y = jnp.dot(x, m_ref[s], preferred_element_type=jnp.float32)
            out_ref[0, :, f * HW:(f + 1) * HW] = jnp.clip(y, 0.0, 1.0)


@partial(jax.jit, static_argnums=(4,))
def transform_background_pallas(image, active_i32, src, m_stack, n_frames):
    B, C, H, W = image.shape
    HW = H * W
    F = n_frames

    x2 = image.reshape(B, C, HW)                     # f32, contiguous reshape only
    m = m_stack.astype(jnp.bfloat16)                 # bf16 MXU operands, f32 accumulate
    S = m.shape[0]

    out_flat = pl.pallas_call(
        _video_kernel,
        out_shape=jax.ShapeDtypeStruct((B, C, F * HW), jnp.float32),
        grid_spec=pltpu.PrefetchScalarGridSpec(
            num_scalar_prefetch=2,
            grid=(B,),
            in_specs=[
                pl.BlockSpec((1, C, HW), lambda b, act, src: (b, 0, 0)),
                # constant block index -> DMA'd once, VMEM-resident for all rows
                pl.BlockSpec((S, HW, HW), lambda b, act, src: (0, 0, 0)),
            ],
            out_specs=pl.BlockSpec((1, C, F * HW), lambda b, act, src: (b, 0, 0)),
        ),
        compiler_params=pltpu.CompilerParams(
            dimension_semantics=("parallel",),
        ),
    )(active_i32, src, x2, m)

    # (B, C, F*H*W) -> (B, C, F, H, W): pure split of the last dim, no transpose.
    return out_flat.reshape(B, C, F, H, W)


# ----------------------------------------------------------------------------- #
# Host-side sampling (mirrors Transform_Background.__init__ / sample_params_shift)
# and packing of the batch-shared kron interpolation stack + per-row src table.
# ----------------------------------------------------------------------------- #
def build_transform_params(image_shape, prob, n_steps, n_frames, step, seed=0):
    # TODO(synk): parameter sampling (random.uniform/randint, active mask) and
    # bicubic weight construction are inherently host-side scalar work.
    B, C, H, W = image_shape
    rng = random.Random(seed)

    speed_rng = (0.2, 1.0)
    time_rng = (0.1, 1.0)
    slope_speed = (speed_rng[1] - speed_rng[0]) / n_steps
    slope_time = (time_rng[1] - time_rng[0]) / n_steps

    # torch.rand(B) > prob -> inactive ; active == (rand <= prob)
    mask_active = np.array([rng.random() <= prob for _ in range(B)])
    n_active = int(mask_active.sum())

    src = np.zeros((B, n_frames), dtype=np.int32)
    info = {"mask_active": mask_active}

    if n_active == 0:
        m_stack = np.zeros((1, H * W, H * W), dtype=np.float32)
        return mask_active.astype(np.int32), src, m_stack, info

    # --- sample_params_shift ---
    res = H
    if step >= n_steps:
        speed_max = speed_rng[1]
        time_max = time_rng[1]
    else:
        speed_max = speed_rng[0] + step * slope_speed
        time_max = time_rng[0] + step * slope_time
    speed_max = max(1, speed_max * res / n_frames)
    speed_min = max(1, speed_rng[0] * res / n_frames)
    speed = rng.uniform(speed_min, speed_max)
    time_max = min(n_frames, max(2, int(time_max * n_frames)))
    time_min = min(n_frames, max(2, int(time_rng[0] * n_frames)))
    time = rng.randint(time_min, time_max)
    angle = rng.uniform(0, 2 * math.pi)

    # --- forward_shift curve / interpolation sizes ---
    curve = np.arange(time, dtype=np.float32) * np.float32(speed)
    curve_h = (np.float32(math.sin(angle)) * curve).astype(np.int32)
    curve_w = (np.float32(math.cos(angle)) * curve).astype(np.int32)
    end_h, end_w = int(curve_h[-1]), int(curve_w[-1])
    min_h, min_w = min(0, end_h), min(0, end_w)
    diff_h, diff_w = abs(end_h) + 1, abs(end_w) + 1
    diff = max(diff_h, diff_w)
    curve_h = curve_h - min_h + (diff - diff_h) // 2
    curve_w = curve_w - min_w + (diff - diff_w) // 2

    wh_full = _bicubic_matrix(H, H + diff)  # (H+diff, H)
    ww_full = _bicubic_matrix(W, W + diff)  # (W+diff, W)

    # Batch-shared kron stack: one (H*W, H*W) matrix per distinct source frame s.
    # M_s[h*W+w, h'*W+w'] = Wh_s[h', h] * Ww_s[w', w]  =>  out_f = x2 @ M_{src[b,f]}.
    m_stack = np.zeros((time, H * W, H * W), dtype=np.float32)
    for s in range(time):
        h0, w0 = int(curve_h[s]), int(curve_w[s])
        wh_s = wh_full[h0:h0 + H, :]          # (H, H)
        ww_s = ww_full[w0:w0 + W, :]          # (W, W)
        m_stack[s] = np.kron(wh_s.T, ww_s.T)

    # Replicate-frame padding -> per-row source-frame table.
    n_empty = n_frames - time
    for b in range(B):
        if not mask_active[b]:
            continue
        left = rng.randrange(n_empty) if n_empty > 0 else 0
        src[b] = np.clip(np.arange(n_frames) - left, 0, time - 1)

    info.update(wh_full=wh_full, ww_full=ww_full,
                curve_h=curve_h, curve_w=curve_w, time=time)
    return mask_active.astype(np.int32), src, m_stack, info


# ----------------------------------------------------------------------------- #
# Pure-numpy reference (the "PyTorch way": full interp -> clip -> crop -> pad)
# ----------------------------------------------------------------------------- #
def reference_numpy(image, n_frames, active_i32, src, info):
    B, C, H, W = image.shape
    out = np.zeros((B, C, n_frames, H, W), dtype=np.float32)
    for b in range(B):
        if active_i32[b] == 0:
            out[b] = np.repeat(image[b][:, None, :, :], n_frames, axis=1)
        else:
            wh_full, ww_full = info["wh_full"], info["ww_full"]
            curve_h, curve_w = info["curve_h"], info["curve_w"]
            interp = np.einsum("ih,chw->ciw", wh_full, image[b])
            interp = np.einsum("ciw,jw->cij", interp, ww_full)
            interp = np.clip(interp, 0.0, 1.0)
            for f in range(n_frames):
                s = int(src[b, f])
                h, w = int(curve_h[s]), int(curve_w[s])
                out[b, :, f] = interp[:, h:h + H, w:w + W]
    return out


if __name__ == "__main__":
    # module config (Transform_Background(prob, n_steps)) + forward args
    prob, n_steps = 0.8, 10
    B, C, H, W = 4, 4, 16, 16
    n_frames, step = 8, 5

    key = jax.random.PRNGKey(0)
    image_np = np.asarray(
        jax.random.uniform(key, (B, C, H, W), dtype=jnp.float32, minval=0.0, maxval=1.0)
    )

    active_i32, src, m_stack, info = build_transform_params(
        (B, C, H, W), prob, n_steps, n_frames, step, seed=0
    )

    out = transform_background_pallas(
        jnp.asarray(image_np),
        jnp.asarray(active_i32, dtype=jnp.int32),
        jnp.asarray(src, dtype=jnp.int32),
        jnp.asarray(m_stack),
        n_frames,
    )
    out = jax.block_until_ready(out)

    assert out.shape == (B, C, n_frames, H, W)
    ref = reference_numpy(image_np, n_frames, active_i32, src, info)
    max_diff = float(np.max(np.abs(np.asarray(out) - ref)))
    assert np.allclose(np.asarray(out), ref, atol=5e-2), (
        "mismatch: max abs diff = %g" % max_diff
    )
    print("KERNEL_OK")
</pallas_src>

<mosaic_0001>
module attributes {stable_mosaic.version = 11 : i64} {
  func.func @_video_kernel(%arg0: i32, %arg1: memref<4xi32, #tpu.memory_space<smem>>, %arg2: memref<4x8xi32, #tpu.memory_space<smem>>, %arg3: memref<1x4x256xf32, #tpu.memory_space<vmem>>, %arg4: memref<3x256x256xbf16, #tpu.memory_space<vmem>>, %arg5: memref<1x4x2048xf32, #tpu.memory_space<vmem>>) attributes {dimension_semantics = [#tpu.dimension_semantics<parallel>], iteration_bounds = array<i64: 4>, scalar_prefetch = 2 : i64, scratch_operands = 0 : i64, tpu.core_type = #tpu.core_type<tc>, window_params = [{transform_indices = @transform_0, window_bounds = array<i64: 1, 4, 256>}, {pipeline_mode = #tpu.pipeline_mode<synchronous>, transform_indices = @transform_1, window_bounds = array<i64: 3, 256, 256>}, {transform_indices = @transform_2, window_bounds = array<i64: 1, 4, 2048>}]} {
    %0 = arith.index_cast %arg0 : i32 to index
    %1 = memref.load %arg1[%0] : memref<4xi32, #tpu.memory_space<smem>>
    %c0_i32 = arith.constant 0 : i32
    %2 = arith.cmpi eq, %1, %c0_i32 : i32
    %3 = arith.extui %2 : i1 to i32
    %c0_i32_0 = arith.constant 0 : i32
    %4 = arith.cmpi ne, %3, %c0_i32_0 : i32
    scf.if %4 {
      %c0 = arith.constant 0 : index
      %c0_3 = arith.constant 0 : index
      %c0_4 = arith.constant 0 : index
      %10 = vector.load %arg3[%c0, %c0_3, %c0_4] : memref<1x4x256xf32, #tpu.memory_space<vmem>>, vector<1x4x256xf32>
      %11 = vector.shape_cast %10 : vector<1x4x256xf32> to vector<4x256xf32>
      %c0_5 = arith.constant 0 : index
      %c0_6 = arith.constant 0 : index
      %c0_7 = arith.constant 0 : index
      %12 = vector.load %arg5[%c0_5, %c0_6, %c0_7] : memref<1x4x2048xf32, #tpu.memory_space<vmem>>, vector<1x4x256xf32>
      %13 = vector.shape_cast %12 : vector<1x4x256xf32> to vector<4x256xf32>
      %14 = vector.shape_cast %11 : vector<4x256xf32> to vector<1x4x256xf32>
      tpu.vector_store %arg5[%c0_5, %c0_6, %c0_7], %14 {strides = array<i32>} : memref<1x4x2048xf32, #tpu.memory_space<vmem>>, vector<1x4x256xf32>,
      %c0_8 = arith.constant 0 : index
      %c0_9 = arith.constant 0 : index
      %c256 = arith.constant 256 : index
      %15 = vector.load %arg5[%c0_8, %c0_9, %c256] : memref<1x4x2048xf32, #tpu.memory_space<vmem>>, vector<1x4x256xf32>
      %16 = vector.shape_cast %15 : vector<1x4x256xf32> to vector<4x256xf32>
      %17 = vector.shape_cast %11 : vector<4x256xf32> to vector<1x4x256xf32>
      tpu.vector_store %arg5[%c0_8, %c0_9, %c256], %17 {strides = array<i32>} : memref<1x4x2048xf32, #tpu.memory_space<vmem>>, vector<1x4x256xf32>,
      %c0_10 = arith.constant 0 : index
      %c0_11 = arith.constant 0 : index
      %c512 = arith.constant 512 : index
      %18 = vector.load %arg5[%c0_10, %c0_11, %c512] : memref<1x4x2048xf32, #tpu.memory_space<vmem>>, vector<1x4x256xf32>
      %19 = vector.shape_cast %18 : vector<1x4x256xf32> to vector<4x256xf32>
      %20 = vector.shape_cast %11 : vector<4x256xf32> to vector<1x4x256xf32>
      tpu.vector_store %arg5[%c0_10, %c0_11, %c512], %20 {strides = array<i32>} : memref<1x4x2048xf32, #tpu.memory_space<vmem>>, vector<1x4x256xf32>,
      %c0_12 = arith.constant 0 : index
      %c0_13 = arith.constant 0 : index
      %c768 = arith.constant 768 : index
      %21 = vector.load %arg5[%c0_12, %c0_13, %c768] : memref<1x4x2048xf32, #tpu.memory_space<vmem>>, vector<1x4x256xf32>
      %22 = vector.shape_cast %21 : vector<1x4x256xf32> to vector<4x256xf32>
      %23 = vector.shape_cast %11 : vector<4x256xf32> to vector<1x4x256xf32>
      tpu.vector_store %arg5[%c0_12, %c0_13, %c768], %23 {strides = array<i32>} : memref<1x4x2048xf32, #tpu.memory_space<vmem>>, vector<1x4x256xf32>,
      %c0_14 = arith.constant 0 : index
      %c0_15 = arith.constant 0 : index
      %c1024 = arith.constant 1024 : index
      %24 = vector.load %arg5[%c0_14, %c0_15, %c1024] : memref<1x4x2048xf32, #tpu.memory_space<vmem>>, vector<1x4x256xf32>
      %25 = vector.shape_cast %24 : vector<1x4x256xf32> to vector<4x256xf32>
      %26 = vector.shape_cast %11 : vector<4x256xf32> to vector<1x4x256xf32>
      tpu.vector_store %arg5[%c0_14, %c0_15, %c1024], %26 {strides = array<i32>} : memref<1x4x2048xf32, #tpu.memory_space<vmem>>, vector<1x4x256xf32>,
      %c0_16 = arith.constant 0 : index
      %c0_17 = arith.constant 0 : index
      %c1280 = arith.constant 1280 : index
      %27 = vector.load %arg5[%c0_16, %c0_17, %c1280] : memref<1x4x2048xf32, #tpu.memory_space<vmem>>, vector<1x4x256xf32>
      %28 = vector.shape_cast %27 : vector<1x4x256xf32> to vector<4x256xf32>
      %29 = vector.shape_cast %11 : vector<4x256xf32> to vector<1x4x256xf32>
      tpu.vector_store %arg5[%c0_16, %c0_17, %c1280], %29 {strides = array<i32>} : memref<1x4x2048xf32, #tpu.memory_space<vmem>>, vector<1x4x256xf32>,
      %c0_18 = arith.constant 0 : index
      %c0_19 = arith.constant 0 : index
      %c1536 = arith.constant 1536 : index
      %30 = vector.load %arg5[%c0_18, %c0_19, %c1536] : memref<1x4x2048xf32, #tpu.memory_space<vmem>>, vector<1x4x256xf32>
      %31 = vector.shape_cast %30 : vector<1x4x256xf32> to vector<4x256xf32>
      %32 = vector.shape_cast %11 : vector<4x256xf32> to vector<1x4x256xf32>
      tpu.vector_store %arg5[%c0_18, %c0_19, %c1536], %32 {strides = array<i32>} : memref<1x4x2048xf32, #tpu.memory_space<vmem>>, vector<1x4x256xf32>,
      %c0_20 = arith.constant 0 : index
      %c0_21 = arith.constant 0 : index
      %c1792 = arith.constant 1792 : index
      %33 = vector.load %arg5[%c0_20, %c0_21, %c1792] : memref<1x4x2048xf32, #tpu.memory_space<vmem>>, vector<1x4x256xf32>
      %34 = vector.shape_cast %33 : vector<1x4x256xf32> to vector<4x256xf32>
      %35 = vector.shape_cast %11 : vector<4x256xf32> to vector<1x4x256xf32>
      tpu.vector_store %arg5[%c0_20, %c0_21, %c1792], %35 {strides = array<i32>} : memref<1x4x2048xf32, #tpu.memory_space<vmem>>, vector<1x4x256xf32>,
    } else {
    }
    %5 = arith.index_cast %arg0 : i32 to index
    %6 = memref.load %arg1[%5] : memref<4xi32, #tpu.memory_space<smem>>
    %c0_i32_1 = arith.constant 0 : i32
    %7 = arith.cmpi ne, %6, %c0_i32_1 : i32
    %8 = arith.extui %7 : i1 to i32
    %c0_i32_2 = arith.constant 0 : i32
    %9 = arith.cmpi ne, %8, %c0_i32_2 : i32
    scf.if %9 {
      %c0 = arith.constant 0 : index
      %c0_3 = arith.constant 0 : index
      %c0_4 = arith.constant 0 : index
      %10 = vector.load %arg3[%c0, %c0_3, %c0_4] : memref<1x4x256xf32, #tpu.memory_space<vmem>>, vector<1x4x256xf32>
      %11 = vector.shape_cast %10 : vector<1x4x256xf32> to vector<4x256xf32>
      %12 = arith.truncf %11 : vector<4x256xf32> to vector<4x256xbf16>
      %13 = arith.index_cast %arg0 : i32 to index
      %c0_5 = arith.constant 0 : index
      %14 = memref.load %arg2[%13, %c0_5] : memref<4x8xi32, #tpu.memory_space<smem>>
      %15 = arith.index_cast %14 : i32 to index
      %c0_6 = arith.constant 0 : index
      %c0_7 = arith.constant 0 : index
      %16 = vector.load %arg4[%15, %c0_6, %c0_7] : memref<3x256x256xbf16, #tpu.memory_space<vmem>>, vector<1x256x256xbf16>
      %17 = vector.shape_cast %16 : vector<1x256x256xbf16> to vector<256x256xbf16>
      %cst = arith.constant dense<0.000000e+00> : vector<4x256xf32>
      %18 = tpu.matmul %12, %17, %cst {dimension_numbers = #tpu.dot_dimension_numbers<[1], [0], [0], [1], [0, 0, 1, 1], [], []>} : vector<4x256xbf16>, vector<256x256xbf16>, vector<4x256xf32> -> vector<4x256xf32>
      %cst_8 = arith.constant 0.000000e+00 : f32
      %cst_9 = arith.constant 1.000000e+00 : f32
      %19 = vector.broadcast %cst_8 : f32 to vector<4x256xf32>
      %20 = arith.maximumf %19, %18 : vector<4x256xf32>
      %21 = vector.broadcast %cst_9 : f32 to vector<4x256xf32>
      %22 = arith.minimumf %21, %20 : vector<4x256xf32>
      %c0_10 = arith.constant 0 : index
      %c0_11 = arith.constant 0 : index
      %c0_12 = arith.constant 0 : index
      %23 = vector.load %arg5[%c0_10, %c0_11, %c0_12] : memref<1x4x2048xf32, #tpu.memory_space<vmem>>, vector<1x4x256xf32>
      %24 = vector.shape_cast %23 : vector<1x4x256xf32> to vector<4x256xf32>
      %25 = vector.shape_cast %22 : vector<4x256xf32> to vector<1x4x256xf32>
      tpu.vector_store %arg5[%c0_10, %c0_11, %c0_12], %25 {strides = array<i32>} : memref<1x4x2048xf32, #tpu.memory_space<vmem>>, vector<1x4x256xf32>,
      %26 = arith.index_cast %arg0 : i32 to index
      %c1 = arith.constant 1 : index
      %27 = memref.load %arg2[%26, %c1] : memref<4x8xi32, #tpu.memory_space<smem>>
      %28 = arith.index_cast %27 : i32 to index
      %c0_13 = arith.constant 0 : index
      %c0_14 = arith.constant 0 : index
      %29 = vector.load %arg4[%28, %c0_13, %c0_14] : memref<3x256x256xbf16, #tpu.memory_space<vmem>>, vector<1x256x256xbf16>
      %30 = vector.shape_cast %29 : vector<1x256x256xbf16> to vector<256x256xbf16>
      %cst_15 = arith.constant dense<0.000000e+00> : vector<4x256xf32>
      %31 = tpu.matmul %12, %30, %cst_15 {dimension_numbers = #tpu.dot_dimension_numbers<[1], [0], [0], [1], [0, 0, 1, 1], [], []>} : vector<4x256xbf16>, vector<256x256xbf16>, vector<4x256xf32> -> vector<4x256xf32>
      %cst_16 = arith.constant 0.000000e+00 : f32
      %cst_17 = arith.constant 1.000000e+00 : f32
      %32 = vector.broadcast %cst_16 : f32 to vector<4x256xf32>
      %33 = arith.maximumf %32, %31 : vector<4x256xf32>
      %34 = vector.broadcast %cst_17 : f32 to vector<4x256xf32>
      %35 = arith.minimumf %34, %33 : vector<4x256xf32>
      %c0_18 = arith.constant 0 : index
      %c0_19 = arith.constant 0 : index
      %c256 = arith.constant 256 : index
      %36 = vector.load %arg5[%c0_18, %c0_19, %c256] : memref<1x4x2048xf32, #tpu.memory_space<vmem>>, vector<1x4x256xf32>
      %37 = vector.shape_cast %36 : vector<1x4x256xf32> to vector<4x256xf32>
      %38 = vector.shape_cast %35 : vector<4x256xf32> to vector<1x4x256xf32>
      tpu.vector_store %arg5[%c0_18, %c0_19, %c256], %38 {strides = array<i32>} : memref<1x4x2048xf32, #tpu.memory_space<vmem>>, vector<1x4x256xf32>,
      %39 = arith.index_cast %arg0 : i32 to index
      %c2 = arith.constant 2 : index
      %40 = memref.load %arg2[%39, %c2] : memref<4x8xi32, #tpu.memory_space<smem>>
      %41 = arith.index_cast %40 : i32 to index
      %c0_20 = arith.constant 0 : index
      %c0_21 = arith.constant 0 : index
      %42 = vector.load %arg4[%41, %c0_20, %c0_21] : memref<3x256x256xbf16, #tpu.memory_space<vmem>>, vector<1x256x256xbf16>
      %43 = vector.shape_cast %42 : vector<1x256x256xbf16> to vector<256x256xbf16>
      %cst_22 = arith.constant dense<0.000000e+00> : vector<4x256xf32>
      %44 = tpu.matmul %12, %43, %cst_22 {dimension_numbers = #tpu.dot_dimension_numbers<[1], [0], [0], [1], [0, 0, 1, 1], [], []>} : vector<4x256xbf16>, vector<256x256xbf16>, vector<4x256xf32> -> vector<4x256xf32>
      %cst_23 = arith.constant 0.000000e+00 : f32
      %cst_24 = arith.constant 1.000000e+00 : f32
      %45 = vector.broadcast %cst_23 : f32 to vector<4x256xf32>
      %46 = arith.maximumf %45, %44 : vector<4x256xf32>
      %47 = vector.broadcast %cst_24 : f32 to vector<4x256xf32>
      %48 = arith.minimumf %47, %46 : vector<4x256xf32>
      %c0_25 = arith.constant 0 : index
      %c0_26 = arith.constant 0 : index
      %c512 = arith.constant 512 : index
      %49 = vector.load %arg5[%c0_25, %c0_26, %c512] : memref<1x4x2048xf32, #tpu.memory_space<vmem>>, vector<1x4x256xf32>
      %50 = vector.shape_cast %49 : vector<1x4x256xf32> to vector<4x256xf32>
      %51 = vector.shape_cast %48 : vector<4x256xf32> to vector<1x4x256xf32>
      tpu.vector_store %arg5[%c0_25, %c0_26, %c512], %51 {strides = array<i32>} : memref<1x4x2048xf32, #tpu.memory_space<vmem>>, vector<1x4x256xf32>,
      %52 = arith.index_cast %arg0 : i32 to index
      %c3 = arith.constant 3 : index
      %53 = memref.load %arg2[%52, %c3] : memref<4x8xi32, #tpu.memory_space<smem>>
      %54 = arith.index_cast %53 : i32 to index
      %c0_27 = arith.constant 0 : index
      %c0_28 = arith.constant 0 : index
      %55 = vector.load %arg4[%54, %c0_27, %c0_28] : memref<3x256x256xbf16, #tpu.memory_space<vmem>>, vector<1x256x256xbf16>
      %56 = vector.shape_cast %55 : vector<1x256x256xbf16> to vector<256x256xbf16>
      %cst_29 = arith.constant dense<0.000000e+00> : vector<4x256xf32>
      %57 = tpu.matmul %12, %56, %cst_29 {dimension_numbers = #tpu.dot_dimension_numbers<[1], [0], [0], [1], [0, 0, 1, 1], [], []>} : vector<4x256xbf16>, vector<256x256xbf16>, vector<4x256xf32> -> vector<4x256xf32>
      %cst_30 = arith.constant 0.000000e+00 : f32
      %cst_31 = arith.constant 1.000000e+00 : f32
      %58 = vector.broadcast %cst_30 : f32 to vector<4x256xf32>
      %59 = arith.maximumf %58, %57 : vector<4x256xf32>
      %60 = vector.broadcast %cst_31 : f32 to vector<4x256xf32>
      %61 = arith.minimumf %60, %59 : vector<4x256xf32>
      %c0_32 = arith.constant 0 : index
      %c0_33 = arith.constant 0 : index
      %c768 = arith.constant 768 : index
      %62 = vector.load %arg5[%c0_32, %c0_33, %c768] : memref<1x4x2048xf32, #tpu.memory_space<vmem>>, vector<1x4x256xf32>
      %63 = vector.shape_cast %62 : vector<1x4x256xf32> to vector<4x256xf32>
      %64 = vector.shape_cast %61 : vector<4x256xf32> to vector<1x4x256xf32>
      tpu.vector_store %arg5[%c0_32, %c0_33, %c768], %64 {strides = array<i32>} : memref<1x4x2048xf32, #tpu.memory_space<vmem>>, vector<1x4x256xf32>,
      %65 = arith.index_cast %arg0 : i32 to index
      %c4 = arith.constant 4 : index
      %66 = memref.load %arg2[%65, %c4] : memref<4x8xi32, #tpu.memory_space<smem>>
      %67 = arith.index_cast %66 : i32 to index
      %c0_34 = arith.constant 0 : index
      %c0_35 = arith.constant 0 : index
      %68 = vector.load %arg4[%67, %c0_34, %c0_35] : memref<3x256x256xbf16, #tpu.memory_space<vmem>>, vector<1x256x256xbf16>
      %69 = vector.shape_cast %68 : vector<1x256x256xbf16> to vector<256x256xbf16>
      %cst_36 = arith.constant dense<0.000000e+00> : vector<4x256xf32>
      %70 = tpu.matmul %12, %69, %cst_36 {dimension_numbers = #tpu.dot_dimension_numbers<[1], [0], [0], [1], [0, 0, 1, 1], [], []>} : vector<4x256xbf16>, vector<256x256xbf16>, vector<4x256xf32> -> vector<4x256xf32>
      %cst_37 = arith.constant 0.000000e+00 : f32
      %cst_38 = arith.constant 1.000000e+00 : f32
      %71 = vector.broadcast %cst_37 : f32 to vector<4x256xf32>
      %72 = arith.maximumf %71, %70 : vector<4x256xf32>
      %73 = vector.broadcast %cst_38 : f32 to vector<4x256xf32>
      %74 = arith.minimumf %73, %72 : vector<4x256xf32>
      %c0_39 = arith.constant 0 : index
      %c0_40 = arith.constant 0 : index
      %c1024 = arith.constant 1024 : index
      %75 = vector.load %arg5[%c0_39, %c0_40, %c1024] : memref<1x4x2048xf32, #tpu.memory_space<vmem>>, vector<1x4x256xf32>
      %76 = vector.shape_cast %75 : vector<1x4x256xf32> to vector<4x256xf32>
      %77 = vector.shape_cast %74 : vector<4x256xf32> to vector<1x4x256xf32>
      tpu.vector_store %arg5[%c0_39, %c0_40, %c1024], %77 {strides = array<i32>} : memref<1x4x2048xf32, #tpu.memory_space<vmem>>, vector<1x4x256xf32>,
      %78 = arith.index_cast %arg0 : i32 to index
      %c5 = arith.constant 5 : index
      %79 = memref.load %arg2[%78, %c5] : memref<4x8xi32, #tpu.memory_space<smem>>
      %80 = arith.index_cast %79 : i32 to index
      %c0_41 = arith.constant 0 : index
      %c0_42 = arith.constant 0 : index
      %81 = vector.load %arg4[%80, %c0_41, %c0_42] : memref<3x256x256xbf16, #tpu.memory_space<vmem>>, vector<1x256x256xbf16>
      %82 = vector.shape_cast %81 : vector<1x256x256xbf16> to vector<256x256xbf16>
      %cst_43 = arith.constant dense<0.000000e+00> : vector<4x256xf32>
      %83 = tpu.matmul %12, %82, %cst_43 {dimension_numbers = #tpu.dot_dimension_numbers<[1], [0], [0], [1], [0, 0, 1, 1], [], []>} : vector<4x256xbf16>, vector<256x256xbf16>, vector<4x256xf32> -> vector<4x256xf32>
      %cst_44 = arith.constant 0.000000e+00 : f32
      %cst_45 = arith.constant 1.000000e+00 : f32
      %84 = vector.broadcast %cst_44 : f32 to vector<4x256xf32>
      %85 = arith.maximumf %84, %83 : vector<4x256xf32>
      %86 = vector.broadcast %cst_45 : f32 to vector<4x256xf32>
      %87 = arith.minimumf %86, %85 : vector<4x256xf32>
      %c0_46 = arith.constant 0 : index
      %c0_47 = arith.constant 0 : index
      %c1280 = arith.constant 1280 : index
      %88 = vector.load %arg5[%c0_46, %c0_47, %c1280] : memref<1x4x2048xf32, #tpu.memory_space<vmem>>, vector<1x4x256xf32>
      %89 = vector.shape_cast %88 : vector<1x4x256xf32> to vector<4x256xf32>
      %90 = vector.shape_cast %87 : vector<4x256xf32> to vector<1x4x256xf32>
      tpu.vector_store %arg5[%c0_46, %c0_47, %c1280], %90 {strides = array<i32>} : memref<1x4x2048xf32, #tpu.memory_space<vmem>>, vector<1x4x256xf32>,
      %91 = arith.index_cast %arg0 : i32 to index
      %c6 = arith.constant 6 : index
      %92 = memref.load %arg2[%91, %c6] : memref<4x8xi32, #tpu.memory_space<smem>>
      %93 = arith.index_cast %92 : i32 to index
      %c0_48 = arith.constant 0 : index
      %c0_49 = arith.constant 0 : index
      %94 = vector.load %arg4[%93, %c0_48, %c0_49] : memref<3x256x256xbf16, #tpu.memory_space<vmem>>, vector<1x256x256xbf16>
      %95 = vector.shape_cast %94 : vector<1x256x256xbf16> to vector<256x256xbf16>
      %cst_50 = arith.constant dense<0.000000e+00> : vector<4x256xf32>
      %96 = tpu.matmul %12, %95, %cst_50 {dimension_numbers = #tpu.dot_dimension_numbers<[1], [0], [0], [1], [0, 0, 1, 1], [], []>} : vector<4x256xbf16>, vector<256x256xbf16>, vector<4x256xf32> -> vector<4x256xf32>
      %cst_51 = arith.constant 0.000000e+00 : f32
      %cst_52 = arith.constant 1.000000e+00 : f32
      %97 = vector.broadcast %cst_51 : f32 to vector<4x256xf32>
      %98 = arith.maximumf %97, %96 : vector<4x256xf32>
      %99 = vector.broadcast %cst_52 : f32 to vector<4x256xf32>
      %100 = arith.minimumf %99, %98 : vector<4x256xf32>
      %c0_53 = arith.constant 0 : index
      %c0_54 = arith.constant 0 : index
      %c1536 = arith.constant 1536 : index
      %101 = vector.load %arg5[%c0_53, %c0_54, %c1536] : memref<1x4x2048xf32, #tpu.memory_space<vmem>>, vector<1x4x256xf32>
      %102 = vector.shape_cast %101 : vector<1x4x256xf32> to vector<4x256xf32>
      %103 = vector.shape_cast %100 : vector<4x256xf32> to vector<1x4x256xf32>
      tpu.vector_store %arg5[%c0_53, %c0_54, %c1536], %103 {strides = array<i32>} : memref<1x4x2048xf32, #tpu.memory_space<vmem>>, vector<1x4x256xf32>,
      %104 = arith.index_cast %arg0 : i32 to index
      %c7 = arith.constant 7 : index
      %105 = memref.load %arg2[%104, %c7] : memref<4x8xi32, #tpu.memory_space<smem>>
      %106 = arith.index_cast %105 : i32 to index
      %c0_55 = arith.constant 0 : index
      %c0_56 = arith.constant 0 : index
      %107 = vector.load %arg4[%106, %c0_55, %c0_56] : memref<3x256x256xbf16, #tpu.memory_space<vmem>>, vector<1x256x256xbf16>
      %108 = vector.shape_cast %107 : vector<1x256x256xbf16> to vector<256x256xbf16>
      %cst_57 = arith.constant dense<0.000000e+00> : vector<4x256xf32>
      %109 = tpu.matmul %12, %108, %cst_57 {dimension_numbers = #tpu.dot_dimension_numbers<[1], [0], [0], [1], [0, 0, 1, 1], [], []>} : vector<4x256xbf16>, vector<256x256xbf16>, vector<4x256xf32> -> vector<4x256xf32>
      %cst_58 = arith.constant 0.000000e+00 : f32
      %cst_59 = arith.constant 1.000000e+00 : f32
      %110 = vector.broadcast %cst_58 : f32 to vector<4x256xf32>
      %111 = arith.maximumf %110, %109 : vector<4x256xf32>
      %112 = vector.broadcast %cst_59 : f32 to vector<4x256xf32>
      %113 = arith.minimumf %112, %111 : vector<4x256xf32>
      %c0_60 = arith.constant 0 : index
      %c0_61 = arith.constant 0 : index
      %c1792 = arith.constant 1792 : index
      %114 = vector.load %arg5[%c0_60, %c0_61, %c1792] : memref<1x4x2048xf32, #tpu.memory_space<vmem>>, vector<1x4x256xf32>
      %115 = vector.shape_cast %114 : vector<1x4x256xf32> to vector<4x256xf32>
      %116 = vector.shape_cast %113 : vector<4x256xf32> to vector<1x4x256xf32>
      tpu.vector_store %arg5[%c0_60, %c0_61, %c1792], %116 {strides = array<i32>} : memref<1x4x2048xf32, #tpu.memory_space<vmem>>, vector<1x4x256xf32>,
    } else {
    }
    return
  }
  func.func @transform_0(%arg0: i32, %arg1: memref<4xi32, #tpu.memory_space<smem>>, %arg2: memref<4x8xi32, #tpu.memory_space<smem>>) -> (i32, i32, i32) {
    %c0_i32 = arith.constant 0 : i32
    %c0_i32_0 = arith.constant 0 : i32
    %c0_i32_1 = arith.constant 0 : i32
    return %arg0, %c0_i32, %c0_i32_0 : i32, i32, i32
  }
  func.func @transform_1(%arg0: i32, %arg1: memref<4xi32, #tpu.memory_space<smem>>, %arg2: memref<4x8xi32, #tpu.memory_space<smem>>) -> (i32, i32, i32) {
    %c0_i32 = arith.constant 0 : i32
    %c0_i32_0 = arith.constant 0 : i32
    %c0_i32_1 = arith.constant 0 : i32
    %c0_i32_2 = arith.constant 0 : i32
    return %c0_i32, %c0_i32_0, %c0_i32_1 : i32, i32, i32
  }
  func.func @transform_2(%arg0: i32, %arg1: memref<4xi32, #tpu.memory_space<smem>>, %arg2: memref<4x8xi32, #tpu.memory_space<smem>>) -> (i32, i32, i32) {
    %c0_i32 = arith.constant 0 : i32
    %c0_i32_0 = arith.constant 0 : i32
    %c0_i32_1 = arith.constant 0 : i32
    return %arg0, %c0_i32, %c0_i32_0 : i32, i32, i32
  }
}

</mosaic_0001>

<bundles_post_ra>
// kernel: transform_background_pallas.1
= control target key start
LH: loop header
LB: loop body
LE: loop exit
PB: predicated region body
PF: predicated region fallthrough
CT: control target
= control target key end

     0   :  { %s3695_s21 = smov [#allocation3]   ;;  %s3696_s22 = smov [#allocation4]   ;;  %s4396_s0 = inlined_call_operand.vmem [shape: s32[4], index: 0, kind: input, shape index: {}]   ;;  %s4397_s2 = inlined_call_operand.vmem [shape: f32[4,4,256], index: 2, kind: input, shape index: {}]   ;;  %s4398_s3 = inlined_call_operand.vmem [shape: bf16[3,256,256], index: 3, kind: input, shape index: {}]   ;;  %s4399_s4 = inlined_call_operand.vmem [shape: f32[4,4,2048], index: 4, kind: output, shape index: {}]   ;;  %s4400_s1 = inlined_call_operand.vmem [shape: s32[4,8], index: 1, kind: input, shape index: {}]  }
   0x1   :  { %s10_s17 = sshll.u32 %s4396_s0, 4  ;;  %s15_s20 = sshll.u32 %s4400_s1, 4  ;;  %s11_s17 = int_to_ptr.vmem [resolvable:$true] %s10_s17  ;;  %s16_s20 = int_to_ptr.vmem [resolvable:$true] %s15_s20 }
   0x2   :  { %13 = dma.vmem_to_smem %s11_s17, 16, %s3695_s21, [#allocation2] }
   0x3   :  { %18 = dma.vmem_to_smem %s16_s20, 64, %s3696_s22, [#allocation2] }
   0x4   :  { %3689 = dma.done.wait [#allocation2], 80 }
   0x5   :  { %3690 = vsyncadd [#allocation2], 4294967216 }
   0x6   :  { %21 = sfence }
   0x7   :  { %s3728_s23 = smov 0  }
   0x8 LB: > { %s2331_s0 = sadd.s32 4294967295, %s3693_s23   ;;  %p2335_p0 = scmp.ge.s32.totalorder %s3693_s23, 1  ;;  %s3693_s23 = sphi %s3728_s23, %s27_s23  }
   0x9   : > { %p127_p1 = scmp.lt.s32.totalorder %s3693_s23, 5 }
   0xb   : > { %p128_p2 = pnand %p2335_p0, %p127_p1 }
   0xc   : > { %p149_p3 = scmp.lt.s32.totalorder (!%p128_p2), %s2331_s0, 3  ;;  %s159_s1 = sld [smem:[#allocation3 + %s2331_s0]] (!%p128_p2) }
   0xd   : > { %131 = sbr.rel (%p128_p2) target bundleno = 454 (0x1c6), region = 28 }
  0x12   : > { %s150_s24 = scalar_select %p149_p3, %s2331_s0, 3 }
  0x13   : > { %p2340_p4 = scmp.ne.s32.totalorder %s159_s1, 0 }
  0x14   : > { %s3385_s25 = sshll.u32 %s150_s24, 3  ;;  %s3386_s26 = sshll.u32 %s150_s24, 6 }
  0x15   : > { %s3739_s29 = scalar_lea.vmem %s4397_s2, %s3385_s25  ;;  %s3744_s6 = scalar_lea.vmem %s4399_s4, %s3386_s26 }
  0x16   : > { %163 = sbr.rel (%p2340_p4) target bundleno = 36 (0x24), region = 32 }
  0x1b   : > { %v164_v0 = vld [vmem:[%s3739_s29] sm:$0xff] }
  0x1c   : > { %165 = vst [vmem:[%s3744_s6] sm:$0xff] %v164_v0 }
  0x1d   : > { %166 = vst [vmem:[%s3744_s6 + $0x8] sm:$0xff] %v164_v0 }
  0x1e   : > { %167 = vst [vmem:[%s3744_s6 + $0x10] sm:$0xff] %v164_v0 }
  0x1f   : > { %168 = vst [vmem:[%s3744_s6 + $0x18] sm:$0xff] %v164_v0 }
  0x20   : > { %169 = vst [vmem:[%s3744_s6 + $0x20] sm:$0xff] %v164_v0 }
  0x21   : > { %170 = vst [vmem:[%s3744_s6 + $0x28] sm:$0xff] %v164_v0 }
  0x22   : > { %171 = vst [vmem:[%s3744_s6 + $0x30] sm:$0xff] %v164_v0 }
  0x23   : > { %172 = vst [vmem:[%s3744_s6 + $0x38] sm:$0xff] %v164_v0 }
  0x24 PF: > { %s173_s7 = sld [smem:[#allocation3 + %s2331_s0]] }
  0x2a   : > { %p2341_p5 = scmp.eq.s32.totalorder %s173_s7, 0 }
  0x2b   : > { %s3755_s8 = sshll.u32 (!%p2341_p5), %s2331_s0, 7 }
  0x2c   : > { %177 = sbr.rel (%p2341_p5) target bundleno = 454 (0x1c6), region = 36  ;;  %s188_s9 = sld [smem:[#allocation4 + %s3755_s8]] (!%p2341_p5) }
  0x2d   : > { %s447_s14 = sadd.s32 (!%p2341_p5), 1, %s3755_s8  ;;  %s706_s20 = sadd.s32 (!%p2341_p5), 2, %s3755_s8 }
  0x2e   : > { %s3798_s15 = sld [smem:[#allocation4 + %s447_s14]] (!%p2341_p5)  ;;  %s965_s25 = sadd.s32 (!%p2341_p5), 3, %s3755_s8 }
  0x2f   : > { %s3873_s21 = sld [smem:[#allocation4 + %s706_s20]] (!%p2341_p5)  ;;  %s1224_s5 = sadd.s32 (!%p2341_p5), 4, %s3755_s8 }
  0x30   : > { %s3957_s26 = sld [smem:[#allocation4 + %s965_s25]] (!%p2341_p5) }
  0x31   : > { %s4034_s7 = sld [smem:[#allocation4 + %s1224_s5]]  ;;  %vm443_vm0 = vcmask 1043456  }
  0x32   : > { %s3387_s10 = sshll.u32 %s188_s9, 8 }
  0x33   : > { %s3761_s13 = scalar_lea.vmem %s4398_s3, %s3387_s10 }
  0x34   : > { %v2403_v1 = vld [vmem:[%s3761_s13 + $0x70] sm:$0xf]  ;;  %v3403_v2 = vld [vmem:[%s3761_s13 + $0x74] sm:$0xf0]  ;;  %v3402_v6 = vld [vmem:[%s3761_s13 + $0x74] sm:$0xf] }
  0x35   : > { %v2467_v3 = vld [vmem:[%s3761_s13 + $0xf0] sm:$0xf]  ;;  %v2404_v4 = vor.u32 %v3403_v2, %v2403_v1  ;;  %v3419_v5 = vld [vmem:[%s3761_s13 + $0xf4] sm:$0xf0]  ;;  %v2405_v7 = vld [vmem:[%s3761_s13 + $0x78] sm:$0xf0] }
  0x36   : > { %v2468_v8 = vor.u32 %v3419_v5, %v2467_v3  ;;  %v2408_v9 = vor.u32 %v3402_v6, %v2405_v7  ;;  %v3418_v10 = vld [vmem:[%s3761_s13 + $0xf4] sm:$0xf]  ;;  %v2469_v11 = vld [vmem:[%s3761_s13 + $0xf8] sm:$0xf0]  ;;  %v2395_v12 = vld [vmem:[%s3761_s13 + $0x60] sm:$0xf] }
  0x37   : > { %384 = vmatpush.bf16.msra.mxu0 %v2404_v4  ;;  %v2472_v13 = vor.u32 %v3418_v10, %v2469_v11  ;;  %v3401_v14 = vld [vmem:[%s3761_s13 + $0x64] sm:$0xf0]  ;;  %v2459_v15 = vld [vmem:[%s3761_s13 + $0xe0] sm:$0xf]  ;;  %v3400_v19 = vld [vmem:[%s3761_s13 + $0x64] sm:$0xf] }
  0x38   : > { %v3417_v16 = vld [vmem:[%s3761_s13 + $0xe4] sm:$0xf0]  ;;  %397 = vmatpush.bf16.msra.mxu1 %v2468_v8  ;;  %410 = vmatpush.bf16.msra.mxu2 %v2408_v9  ;;  %v2396_v17 = vor.u32 %v3401_v14, %v2395_v12  ;;  %v2397_v20 = vld [vmem:[%s3761_s13 + $0x68] sm:$0xf0]  ;;  %v3416_v21 = vld [vmem:[%s3761_s13 + $0xe4] sm:$0xf] }
  0x39   : > { %v2460_v18 = vor.u32 %v3417_v16, %v2459_v15  ;;  %423 = vmatpush.bf16.msra.mxu3 %v2472_v13  ;;  %v2400_v22 = vor.u32 %v3400_v19, %v2397_v20  ;;  %v2461_v23 = vld [vmem:[%s3761_s13 + $0xe8] sm:$0xf0]  ;;  %v2387_v24 = vld [vmem:[%s3761_s13 + $0x50] sm:$0xf]  ;;  %v3399_v25 = vld [vmem:[%s3761_s13 + $0x54] sm:$0xf0] }
  0x3a   : > { %v2464_v26 = vor.u32 %v3416_v21, %v2461_v23  ;;  %v2451_v27 = vld [vmem:[%s3761_s13 + $0xd0] sm:$0xf]  ;;  %v3415_v28 = vld [vmem:[%s3761_s13 + $0xd4] sm:$0xf0]  ;;  %v3398_v29 = vld [vmem:[%s3761_s13 + $0x54] sm:$0xf]  ;;  %v2388_v30 = vor.u32 %v3399_v25, %v2387_v24 }
  0x3b   : > { %385 = vmatpush.bf16.msra.mxu0 %v2396_v17  ;;  %v2389_v31 = vld [vmem:[%s3761_s13 + $0x58] sm:$0xf0]  ;;  %v3414_v32 = vld [vmem:[%s3761_s13 + $0xd4] sm:$0xf]  ;;  %v2452_v34 = vor.u32 %v3415_v28, %v2451_v27  ;;  %v2379_v36 = vld [vmem:[%s3761_s13 + $0x40] sm:$0xf] }
  0x3c   : > { %v2453_v33 = vld [vmem:[%s3761_s13 + $0xd8] sm:$0xf0]  ;;  %398 = vmatpush.bf16.msra.mxu1 %v2460_v18  ;;  %411 = vmatpush.bf16.msra.mxu2 %v2400_v22  ;;  %v2392_v35 = vor.u32 %v3398_v29, %v2389_v31  ;;  %v3397_v37 = vld [vmem:[%s3761_s13 + $0x44] sm:$0xf0]  ;;  %v2443_v38 = vld [vmem:[%s3761_s13 + $0xc0] sm:$0xf] }
  0x3d   : > { %424 = vmatpush.bf16.msra.mxu3 %v2464_v26  ;;  %v2456_v39 = vor.u32 %v3414_v32, %v2453_v33  ;;  %v3413_v40 = vld [vmem:[%s3761_s13 + $0xc4] sm:$0xf0]  ;;  %v3396_v41 = vld [vmem:[%s3761_s13 + $0x44] sm:$0xf]  ;;  %v2381_v42 = vld [vmem:[%s3761_s13 + $0x48] sm:$0xf0]  ;;  %v2380_v45 = vor.u32 %v3397_v37, %v2379_v36 }
  0x3e   : > { %v3412_v43 = vld [vmem:[%s3761_s13 + $0xc4] sm:$0xf]  ;;  %v2445_v44 = vld [vmem:[%s3761_s13 + $0xc8] sm:$0xf0]  ;;  %v2444_v46 = vor.u32 %v3413_v40, %v2443_v38  ;;  %v2384_v47 = vor.u32 %v3396_v41, %v2381_v42  ;;  %v2371_v48 = vld [vmem:[%s3761_s13 + $0x30] sm:$0xf] }
  0x3f   : > { %386 = vmatpush.bf16.msra.mxu0 %v2388_v30  ;;  %v3395_v49 = vld [vmem:[%s3761_s13 + $0x34] sm:$0xf0]  ;;  %v2435_v50 = vld [vmem:[%s3761_s13 + $0xb0] sm:$0xf]  ;;  %v2448_v51 = vor.u32 %v3412_v43, %v2445_v44  ;;  %v3394_v53 = vld [vmem:[%s3761_s13 + $0x34] sm:$0xf] }
  0x40   : > { %399 = vmatpush.bf16.msra.mxu1 %v2452_v34  ;;  %412 = vmatpush.bf16.msra.mxu2 %v2392_v35  ;;  %v3411_v52 = vld [vmem:[%s3761_s13 + $0xb4] sm:$0xf0]  ;;  %v2373_v54 = vld [vmem:[%s3761_s13 + $0x38] sm:$0xf0]  ;;  %v3410_v55 = vld [vmem:[%s3761_s13 + $0xb4] sm:$0xf]  ;;  %v2372_v57 = vor.u32 %v3395_v49, %v2371_v48 }
  0x41   : > { %425 = vmatpush.bf16.msra.mxu3 %v2456_v39  ;;  %v2437_v56 = vld [vmem:[%s3761_s13 + $0xb8] sm:$0xf0]  ;;  %v2436_v58 = vor.u32 %v3411_v52, %v2435_v50  ;;  %v2376_v59 = vor.u32 %v3394_v53, %v2373_v54  ;;  %v2363_v60 = vld [vmem:[%s3761_s13 + $0x20] sm:$0xf]  ;;  %v3393_v61 = vld [vmem:[%s3761_s13 + $0x24] sm:$0xf0] }
  0x42   : > { %v2427_v62 = vld [vmem:[%s3761_s13 + $0xa0] sm:$0xf]  ;;  %v2440_v63 = vor.u32 %v3410_v55, %v2437_v56  ;;  %v3409_v0 = vld [vmem:[%s3761_s13 + $0xa4] sm:$0xf0]  ;;  %v3392_v1 = vld [vmem:[%s3761_s13 + $0x24] sm:$0xf]  ;;  %v2364_v5 = vor.u32 %v3393_v61, %v2363_v60 }
  0x43   : > { %387 = vmatpush.bf16.msra.mxu0 %v2380_v45  ;;  %v2365_v2 = vld [vmem:[%s3761_s13 + $0x28] sm:$0xf0]  ;;  %v3408_v3 = vld [vmem:[%s3761_s13 + $0xa4] sm:$0xf]  ;;  %s3420_s16 = sshll.u32 %s3798_s15, 8  ;;  %v2428_v6 = vor.u32 %v3409_v0, %v2427_v62  ;;  %s3453_s22 = sshll.u32 %s3873_s21, 8 }
  0x44   : > { %400 = vmatpush.bf16.msra.mxu1 %v2444_v46  ;;  %413 = vmatpush.bf16.msra.mxu2 %v2384_v47  ;;  %v2429_v4 = vld [vmem:[%s3761_s13 + $0xa8] sm:$0xf0]  ;;  %v2368_v7 = vor.u32 %v3392_v1, %v2365_v2  ;;  %v2355_v8 = vld [vmem:[%s3761_s13 + $0x10] sm:$0xf]  ;;  %v3391_v9 = vld [vmem:[%s3761_s13 + $0x14] sm:$0xf0]  ;;  %s3830_s19 = scalar_lea.vmem %s4398_s3, %s3420_s16  ;;  %s3912_s24 = scalar_lea.vmem %s4398_s3, %s3453_s22 }
  0x45   : > { %426 = vmatpush.bf16.msra.mxu3 %v2448_v51  ;;  %v2419_v10 = vld [vmem:[%s3761_s13 + $0x90] sm:$0xf]  ;;  %v2432_v11 = vor.u32 %v3408_v3, %v2429_v4  ;;  %v3407_v12 = vld [vmem:[%s3761_s13 + $0x94] sm:$0xf0]  ;;  %v3390_v13 = vld [vmem:[%s3761_s13 + $0x14] sm:$0xf]  ;;  %v2356_v17 = vor.u32 %v3391_v9, %v2355_v8 }
  0x46   : > { %v2357_v14 = vld [vmem:[%s3761_s13 + $0x18] sm:$0xf0]  ;;  %v3406_v15 = vld [vmem:[%s3761_s13 + $0x94] sm:$0xf]  ;;  %v2347_v18 = vld [vmem:[%s3761_s13] sm:$0xf]  ;;  %v2420_v20 = vor.u32 %v3407_v12, %v2419_v10 }
  0x47   : > { %388 = vmatpush.bf16.msra.mxu0 %v2372_v57  ;;  %v2421_v16 = vld [vmem:[%s3761_s13 + $0x98] sm:$0xf0]  ;;  %v3389_v19 = vld [vmem:[%s3761_s13 + $0x4] sm:$0xf0]  ;;  %v2360_v21 = vor.u32 %v3390_v13, %v2357_v14  ;;  %v2411_v22 = vld [vmem:[%s3761_s13 + $0x80] sm:$0xf] }
  0x48   : > { %401 = vmatpush.bf16.msra.mxu1 %v2436_v58  ;;  %414 = vmatpush.bf16.msra.mxu2 %v2376_v59  ;;  %v3405_v23 = vld [vmem:[%s3761_s13 + $0x84] sm:$0xf0]  ;;  %v3388_v24 = vld [vmem:[%s3761_s13 + $0x4] sm:$0xf]  ;;  %v2424_v25 = vor.u32 %v3406_v15, %v2421_v16  ;;  %v2349_v26 = vld [vmem:[%s3761_s13 + $0x8] sm:$0xf0]  ;;  %v2348_v32 = vor.u32 %v3389_v19, %v2347_v18 }
  0x49   : > { %427 = vmatpush.bf16.msra.mxu3 %v2440_v63  ;;  %v3404_v27 = vld [vmem:[%s3761_s13 + $0x84] sm:$0xf]  ;;  %v2413_v28 = vld [vmem:[%s3761_s13 + $0x88] sm:$0xf0]  ;;  %v2533_v29 = vld [vmem:[%s3830_s19 + $0x70] sm:$0xf]  ;;  %v2412_v36 = vor.u32 %v3405_v23, %v2411_v22  ;;  %v2352_v37 = vor.u32 %v3388_v24, %v2349_v26 }
  0x4a   : > { %v3436_v30 = vld [vmem:[%s3830_s19 + $0x74] sm:$0xf0]  ;;  %v2597_v31 = vld [vmem:[%s3830_s19 + $0xf0] sm:$0xf]  ;;  %v3435_v34 = vld [vmem:[%s3830_s19 + $0x74] sm:$0xf]  ;;  %v2416_v40 = vor.u32 %v3404_v27, %v2413_v28 }
  0x4b   : > { %389 = vmatpush.bf16.msra.mxu0 %v2364_v5  ;;  %v3452_v33 = vld [vmem:[%s3830_s19 + $0xf4] sm:$0xf0]  ;;  %v2535_v35 = vld [vmem:[%s3830_s19 + $0x78] sm:$0xf0]  ;;  %v3451_v38 = vld [vmem:[%s3830_s19 + $0xf4] sm:$0xf]  ;;  %v2534_v41 = vor.u32 %v3436_v30, %v2533_v29 }
  0x4c   : > { %402 = vmatpush.bf16.msra.mxu1 %v2428_v6  ;;  %415 = vmatpush.bf16.msra.mxu2 %v2368_v7  ;;  %v2599_v39 = vld [vmem:[%s3830_s19 + $0xf8] sm:$0xf0]  ;;  %v2598_v42 = vor.u32 %v3452_v33, %v2597_v31  ;;  %v2538_v43 = vor.u32 %v3435_v34, %v2535_v35  ;;  %v2525_v44 = vld [vmem:[%s3830_s19 + $0x60] sm:$0xf]  ;;  %v3434_v45 = vld [vmem:[%s3830_s19 + $0x64] sm:$0xf0] }
  0x4d   : > { %428 = vmatpush.bf16.msra.mxu3 %v2432_v11  ;;  %v2589_v46 = vld [vmem:[%s3830_s19 + $0xe0] sm:$0xf]  ;;  %v2602_v47 = vor.u32 %v3451_v38, %v2599_v39  ;;  %v3450_v48 = vld [vmem:[%s3830_s19 + $0xe4] sm:$0xf0]  ;;  %v3433_v49 = vld [vmem:[%s3830_s19 + $0x64] sm:$0xf]  ;;  %v2526_v53 = vor.u32 %v3434_v45, %v2525_v44 }
  0x4e   : > { %v2527_v50 = vld [vmem:[%s3830_s19 + $0x68] sm:$0xf0]  ;;  %v3449_v51 = vld [vmem:[%s3830_s19 + $0xe4] sm:$0xf]  ;;  %v2590_v54 = vor.u32 %v3450_v48, %v2589_v46  ;;  %v2517_v56 = vld [vmem:[%s3830_s19 + $0x50] sm:$0xf] }
  0x4f   : > { %390 = vmatpush.bf16.msra.mxu0 %v2356_v17  ;;  %v2591_v52 = vld [vmem:[%s3830_s19 + $0xe8] sm:$0xf0]  ;;  %v2530_v55 = vor.u32 %v3433_v49, %v2527_v50  ;;  %v3432_v57 = vld [vmem:[%s3830_s19 + $0x54] sm:$0xf0]  ;;  %v2581_v58 = vld [vmem:[%s3830_s19 + $0xd0] sm:$0xf] }
  0x50   : > { %403 = vmatpush.bf16.msra.mxu1 %v2420_v20  ;;  %416 = vmatpush.bf16.msra.mxu2 %v2360_v21  ;;  %v2594_v59 = vor.u32 %v3449_v51, %v2591_v52  ;;  %v3448_v60 = vld [vmem:[%s3830_s19 + $0xd4] sm:$0xf0]  ;;  %v3431_v61 = vld [vmem:[%s3830_s19 + $0x54] sm:$0xf]  ;;  %v2519_v62 = vld [vmem:[%s3830_s19 + $0x58] sm:$0xf0]  ;;  %v2518_v1 = vor.u32 %v3432_v57, %v2517_v56 }
  0x51   : > { %429 = vmatpush.bf16.msra.mxu3 %v2424_v25  ;;  %v3447_v63 = vld [vmem:[%s3830_s19 + $0xd4] sm:$0xf]  ;;  %v2583_v0 = vld [vmem:[%s3830_s19 + $0xd8] sm:$0xf0]  ;;  %v2509_v2 = vld [vmem:[%s3830_s19 + $0x40] sm:$0xf]  ;;  %v2582_v4 = vor.u32 %v3448_v60, %v2581_v58  ;;  %v2522_v5 = vor.u32 %v3431_v61, %v2519_v62 }
  0x52   : > { %v178_v3 = vld [vmem:[%s3739_s29] sm:$0xff]  ;;  %v3430_v6 = vld [vmem:[%s3830_s19 + $0x44] sm:$0xf0]  ;;  %v2586_v8 = vor.u32 %v3447_v63, %v2583_v0  ;;  %v2511_v11 = vld [vmem:[%s3830_s19 + $0x48] sm:$0xf0]  ;;  %s3486_s27 = sshll.u32 %s3957_s26, 8 }
  0x53   : > { %391 = vmatpush.bf16.msra.mxu0 %v2348_v32  ;;  %v2573_v7 = vld [vmem:[%s3830_s19 + $0xc0] sm:$0xf]  ;;  %180 = vst [vmem:[#allocation1] ss:$2 sm:$0xff] %v178_v3  ;;  %v3446_v9 = vld [vmem:[%s3830_s19 + $0xc4] sm:$0xf0]  ;;  %v2510_v14 = vor.u32 %v3430_v6, %v2509_v2  ;;  %s3989_s30 = scalar_lea.vmem %s4398_s3, %s3486_s27 }
  0x54   : > { %404 = vmatpush.bf16.msra.mxu1 %v2412_v36  ;;  %417 = vmatpush.bf16.msra.mxu2 %v2352_v37  ;;  %v3429_v10 = vld [vmem:[%s3830_s19 + $0x44] sm:$0xf]  ;;  %v2575_v13 = vld [vmem:[%s3830_s19 + $0xc8] sm:$0xf0]  ;;  %v2501_v15 = vld [vmem:[%s3830_s19 + $0x30] sm:$0xf]  ;;  %v2574_v16 = vor.u32 %v3446_v9, %v2573_v7 }
  0x55   : > { %430 = vmatpush.bf16.msra.mxu3 %v2416_v40  ;;  %v3445_v12 = vld [vmem:[%s3830_s19 + $0xc4] sm:$0xf]  ;;  %v2514_v17 = vor.u32 %v3429_v10, %v2511_v11  ;;  %v3428_v18 = vld [vmem:[%s3830_s19 + $0x34] sm:$0xf0]  ;;  %v2565_v19 = vld [vmem:[%s3830_s19 + $0xb0] sm:$0xf] }
  0x56   : > { %v3444_v20 = vld [vmem:[%s3830_s19 + $0xb4] sm:$0xf0]  ;;  %v2578_v21 = vor.u32 %v3445_v12, %v2575_v13  ;;  %v3427_v22 = vld [vmem:[%s3830_s19 + $0x34] sm:$0xf]  ;;  %v2503_v23 = vld [vmem:[%s3830_s19 + $0x38] sm:$0xf0]  ;;  %v2502_v26 = vor.u32 %v3428_v18, %v2501_v15 }
  0x57   : > { %644 = vmatpush.bf16.msrb.mxu0 %v2534_v41  ;;  %v3443_v24 = vld [vmem:[%s3830_s19 + $0xb4] sm:$0xf]  ;;  %v2567_v25 = vld [vmem:[%s3830_s19 + $0xb8] sm:$0xf0]  ;;  %v2566_v27 = vor.u32 %v3444_v20, %v2565_v19  ;;  %v2506_v30 = vor.u32 %v3427_v22, %v2503_v23  ;;  %v2493_v31 = vld [vmem:[%s3830_s19 + $0x20] sm:$0xf] }
  0x58   : > { %657 = vmatpush.bf16.msrb.mxu1 %v2598_v42  ;;  %670 = vmatpush.bf16.msrb.mxu2 %v2538_v43  ;;  %v3426_v32 = vld [vmem:[%s3830_s19 + $0x24] sm:$0xf0]  ;;  %v2557_v33 = vld [vmem:[%s3830_s19 + $0xa0] sm:$0xf]  ;;  %v2570_v36 = vor.u32 %v3443_v24, %v2567_v25  ;;  %v3425_v38 = vld [vmem:[%s3830_s19 + $0x24] sm:$0xf] }
  0x59   : > { %683 = vmatpush.bf16.msrb.mxu3 %v2602_v47  ;;  %v3442_v37 = vld [vmem:[%s3830_s19 + $0xa4] sm:$0xf0]  ;;  %v2495_v39 = vld [vmem:[%s3830_s19 + $0x28] sm:$0xf0]  ;;  %v3441_v40 = vld [vmem:[%s3830_s19 + $0xa4] sm:$0xf]  ;;  %v2494_v42 = vor.u32 %v3426_v32, %v2493_v31 }
  0x5a   : > { %v181_v28 = vld.sshfl [vmem:[#allocation1] sm:$0xff pattern:$0x75316420]  ;;  %v182_v29 = vld.sshfl [vmem:[#allocation1 + $0x8] sm:$0xff pattern:$0x75316420]  ;;  %v2558_v44 = vor.u32 %v3442_v37, %v2557_v33  ;;  %v2498_v45 = vor.u32 %v3425_v38, %v2495_v39 }
  0x5b   : > { %645 = vmatpush.bf16.msrb.mxu0 %v2526_v53  ;;  %v3885_v34 = vpack.c.bf16 %v181_v28, %v181_v28  ;;  %v3887_v35 = vpack.c.bf16 %v182_v29, %v182_v29  ;;  %v2559_v41 = vld [vmem:[%s3830_s19 + $0xa8] sm:$0xf0]  ;;  %v2485_v43 = vld [vmem:[%s3830_s19 + $0x10] sm:$0xf]  ;;  %v3424_v46 = vld [vmem:[%s3830_s19 + $0x14] sm:$0xf0] }
  0x5c   : > { %658 = vmatpush.bf16.msrb.mxu1 %v2590_v54  ;;  %671 = vmatpush.bf16.msrb.mxu2 %v2530_v55  ;;  %v2549_v47 = vld [vmem:[%s3830_s19 + $0x90] sm:$0xf]  ;;  %v2562_v48 = vor.u32 %v3441_v40, %v2559_v41  ;;  %v3440_v49 = vld [vmem:[%s3830_s19 + $0x94] sm:$0xf0]  ;;  %v3423_v50 = vld [vmem:[%s3830_s19 + $0x14] sm:$0xf]  ;;  %v2486_v54 = vor.u32 %v3424_v46, %v2485_v43 }
  0x5d   : > { %684 = vmatpush.bf16.msrb.mxu3 %v2594_v59  ;;  %418 = vmatmul.bf16.vlgmr.msra.gmra.mxu2 %v3885_v34  ;;  %v2487_v51 = vld [vmem:[%s3830_s19 + $0x18] sm:$0xf0]  ;;  %v3439_v52 = vld [vmem:[%s3830_s19 + $0x94] sm:$0xf]  ;;  %v2477_v55 = vld [vmem:[%s3830_s19] sm:$0xf]  ;;  %v2550_v57 = vor.u32 %v3440_v49, %v2549_v47 }
  0x5e   : > { %431 = vmatmul.bf16.vlgmr.msra.gmra.mxu3 %v3887_v35  ;;  %405 = vmatmul.bf16.vlgmr.msra.gmra.mxu1 %v3887_v35  ;;  %v2551_v53 = vld [vmem:[%s3830_s19 + $0x98] sm:$0xf0]  ;;  %v3422_v56 = vld [vmem:[%s3830_s19 + $0x4] sm:$0xf0]  ;;  %v2490_v58 = vor.u32 %v3423_v50, %v2487_v51  ;;  %v2541_v59 = vld [vmem:[%s3830_s19 + $0x80] sm:$0xf] }
  0x5f   : > { %646 = vmatpush.bf16.msrb.mxu0 %v2518_v1  ;;  %v3438_v60 = vld [vmem:[%s3830_s19 + $0x84] sm:$0xf0]  ;;  %v3421_v61 = vld [vmem:[%s3830_s19 + $0x4] sm:$0xf]  ;;  %v2554_v62 = vor.u32 %v3439_v52, %v2551_v53  ;;  %v2479_v63 = vld [vmem:[%s3830_s19 + $0x8] sm:$0xf0] }
  0x60   : > { %659 = vmatpush.bf16.msrb.mxu1 %v2582_v4  ;;  %672 = vmatpush.bf16.msrb.mxu2 %v2522_v5  ;;  %v3437_v0 = vld [vmem:[%s3830_s19 + $0x84] sm:$0xf]  ;;  %v2543_v1 = vld [vmem:[%s3830_s19 + $0x88] sm:$0xf0]  ;;  %v2663_v2 = vld [vmem:[%s3912_s24 + $0x70] sm:$0xf]  ;;  %v2478_v5 = vor.u32 %v3422_v56, %v2477_v55  ;;  %v2542_v9 = vor.u32 %v3438_v60, %v2541_v59  ;;  %v2482_v10 = vor.u32 %v3421_v61, %v2479_v63 }
  0x61   : > { %685 = vmatpush.bf16.msrb.mxu3 %v2586_v8  ;;  %392 = vmatmul.bf16.vlgmr.msra.gmra.mxu0 %v3885_v34  ;;  %v3469_v3 = vld [vmem:[%s3912_s24 + $0x74] sm:$0xf0]  ;;  %v2727_v4 = vld [vmem:[%s3912_s24 + $0xf0] sm:$0xf]  ;;  %v3468_v7 = vld [vmem:[%s3912_s24 + $0x74] sm:$0xf]  ;;  %v2546_v13 = vor.u32 %v3437_v0, %v2543_v1 }
  0x62   : > { %v3485_v6 = vld [vmem:[%s3912_s24 + $0xf4] sm:$0xf0]  ;;  %v2665_v8 = vld [vmem:[%s3912_s24 + $0x78] sm:$0xf0]  ;;  %v3484_v11 = vld [vmem:[%s3912_s24 + $0xf4] sm:$0xf] }
  0x63   : > { %647 = vmatpush.bf16.msrb.mxu0 %v2510_v14  ;;  %v2729_v12 = vld [vmem:[%s3912_s24 + $0xf8] sm:$0xf0]  ;;  %v2664_v14 = vor.u32 %v3469_v3, %v2663_v2  ;;  %v2728_v15 = vor.u32 %v3485_v6, %v2727_v4  ;;  %v3467_v18 = vld [vmem:[%s3912_s24 + $0x64] sm:$0xf0]  ;;  %v2719_v19 = vld [vmem:[%s3912_s24 + $0xe0] sm:$0xf] }
  0x64   : > { %660 = vmatpush.bf16.msrb.mxu1 %v2574_v16  ;;  %673 = vmatpush.bf16.msrb.mxu2 %v2514_v17  ;;  %v2668_v16 = vor.u32 %v3468_v7, %v2665_v8  ;;  %v2655_v17 = vld [vmem:[%s3912_s24 + $0x60] sm:$0xf]  ;;  %v2732_v20 = vor.u32 %v3484_v11, %v2729_v12  ;;  %v3466_v22 = vld [vmem:[%s3912_s24 + $0x64] sm:$0xf]  ;;  %v2657_v23 = vld [vmem:[%s3912_s24 + $0x68] sm:$0xf0] }
  0x65   : > { %686 = vmatpush.bf16.msrb.mxu3 %v2578_v21  ;;  %v3483_v21 = vld [vmem:[%s3912_s24 + $0xe4] sm:$0xf0]  ;;  %v3482_v24 = vld [vmem:[%s3912_s24 + $0xe4] sm:$0xf]  ;;  %v2721_v25 = vld [vmem:[%s3912_s24 + $0xe8] sm:$0xf0]  ;;  %v2660_v28 = vor.u32 %v3466_v22, %v2657_v23 }
  0x66   : > { %v2647_v29 = vld [vmem:[%s3912_s24 + $0x50] sm:$0xf]  ;;  %v2724_v32 = vor.u32 %v3482_v24, %v2721_v25  ;;  %v3481_v33 = vld [vmem:[%s3912_s24 + $0xd4] sm:$0xf0]  ;;  %v2649_v37 = vld [vmem:[%s3912_s24 + $0x58] sm:$0xf0] }
  0x67   : > { %648 = vmatpush.bf16.msrb.mxu0 %v2502_v26  ;;  %v2656_v26 = vor.u32 %v3467_v18, %v2655_v17  ;;  %v2711_v31 = vld [vmem:[%s3912_s24 + $0xd0] sm:$0xf]  ;;  %v3480_v38 = vld [vmem:[%s3912_s24 + $0xd4] sm:$0xf]  ;;  %v2713_v39 = vld [vmem:[%s3912_s24 + $0xd8] sm:$0xf0] }
  0x68   : > { %661 = vmatpush.bf16.msrb.mxu1 %v2566_v27  ;;  %674 = vmatpush.bf16.msrb.mxu2 %v2506_v30  ;;  %v2720_v27 = vor.u32 %v3483_v21, %v2719_v19  ;;  %v3465_v30 = vld [vmem:[%s3912_s24 + $0x54] sm:$0xf0]  ;;  %v2712_v41 = vor.u32 %v3481_v33, %v2711_v31  ;;  %v2639_v43 = vld [vmem:[%s3912_s24 + $0x40] sm:$0xf]  ;;  %v2716_v46 = vor.u32 %v3480_v38, %v2713_v39  ;;  %v3479_v47 = vld [vmem:[%s3912_s24 + $0xc4] sm:$0xf0] }
  0x69   : > { %687 = vmatpush.bf16.msrb.mxu3 %v2570_v36  ;;  %v3464_v36 = vld [vmem:[%s3912_s24 + $0x54] sm:$0xf]  ;;  %v2648_v40 = vor.u32 %v3465_v30, %v2647_v29  ;;  %v2641_v49 = vld [vmem:[%s3912_s24 + $0x48] sm:$0xf0]  ;;  %v3478_v50 = vld [vmem:[%s3912_s24 + $0xc4] sm:$0xf] }
  0x6a   : > { %v2705_v51 = vld [vmem:[%s3912_s24 + $0xc8] sm:$0xf0]  ;;  %v2631_v55 = vld [vmem:[%s3912_s24 + $0x30] sm:$0xf]  ;;  %v3461_v56 = vld [vmem:[%s3912_s24 + $0x34] sm:$0xf0] }
  0x6b   : > { %649 = vmatpush.bf16.msrb.mxu0 %v2494_v42  ;;  %v2652_v42 = vor.u32 %v3464_v36, %v2649_v37  ;;  %v3477_v59 = vld [vmem:[%s3912_s24 + $0xb4] sm:$0xf0]  ;;  %v3460_v60 = vld [vmem:[%s3912_s24 + $0x34] sm:$0xf]  ;;  %v2633_v61 = vld [vmem:[%s3912_s24 + $0x38] sm:$0xf0]  ;;  %v2632_v0 = vor.u32 %v3461_v56, %v2631_v55 }
  0x6c   : > { %662 = vmatpush.bf16.msrb.mxu1 %v2558_v44  ;;  %675 = vmatpush.bf16.msrb.mxu2 %v2498_v45  ;;  %v3463_v44 = vld [vmem:[%s3912_s24 + $0x44] sm:$0xf0]  ;;  %v2703_v45 = vld [vmem:[%s3912_s24 + $0xc0] sm:$0xf]  ;;  %v2697_v63 = vld [vmem:[%s3912_s24 + $0xb8] sm:$0xf0]  ;;  %v2636_v2 = vor.u32 %v3460_v60, %v2633_v61 }
  0x6d   : > { %688 = vmatpush.bf16.msrb.mxu3 %v2562_v48  ;;  %v3462_v48 = vld [vmem:[%s3912_s24 + $0x44] sm:$0xf]  ;;  %v2640_v52 = vor.u32 %v3463_v44, %v2639_v43  ;;  %v2704_v53 = vor.u32 %v3479_v47, %v2703_v45  ;;  %v2623_v3 = vld [vmem:[%s3912_s24 + $0x20] sm:$0xf]  ;;  %v3459_v4 = vld [vmem:[%s3912_s24 + $0x24] sm:$0xf0] }
  0x6e   : > { %v3475_v7 = vld [vmem:[%s3912_s24 + $0xa4] sm:$0xf0]  ;;  %v3458_v8 = vld [vmem:[%s3912_s24 + $0x24] sm:$0xf]  ;;  %v2689_v11 = vld [vmem:[%s3912_s24 + $0xa8] sm:$0xf0]  ;;  %v2624_v12 = vor.u32 %v3459_v4, %v2623_v3 }
  0x6f   : > { %650 = vmatpush.bf16.msrb.mxu0 %v2486_v54  ;;  %v2644_v54 = vor.u32 %v3462_v48, %v2641_v49  ;;  %v2679_v17 = vld [vmem:[%s3912_s24 + $0x90] sm:$0xf]  ;;  %v3473_v19 = vld [vmem:[%s3912_s24 + $0x94] sm:$0xf0]  ;;  %v2617_v21 = vld [vmem:[%s3912_s24 + $0x18] sm:$0xf0] }
  0x70   : > { %663 = vmatpush.bf16.msrb.mxu1 %v2550_v57  ;;  %676 = vmatpush.bf16.msrb.mxu2 %v2490_v58  ;;  %v2695_v57 = vld [vmem:[%s3912_s24 + $0xb0] sm:$0xf]  ;;  %v2708_v58 = vor.u32 %v3478_v50, %v2705_v51  ;;  %v3472_v22 = vld [vmem:[%s3912_s24 + $0x94] sm:$0xf]  ;;  %v2681_v23 = vld [vmem:[%s3912_s24 + $0x98] sm:$0xf0] }
  0x71   : > { %689 = vmatpush.bf16.msrb.mxu3 %v2554_v62  ;;  %v3476_v62 = vld [vmem:[%s3912_s24 + $0xb4] sm:$0xf]  ;;  %v2696_v1 = vor.u32 %v3477_v59, %v2695_v57  ;;  %v2607_v25 = vld [vmem:[%s3912_s24] sm:$0xf]  ;;  %v3471_v30 = vld [vmem:[%s3912_s24 + $0x84] sm:$0xf0] }
  0x72   : > { %v2700_v6 = vor.u32 %v3476_v62, %v2697_v63  ;;  %v2671_v29 = vld [vmem:[%s3912_s24 + $0x80] sm:$0xf]  ;;  %v3454_v31 = vld [vmem:[%s3912_s24 + $0x4] sm:$0xf]  ;;  %v2609_v33 = vld [vmem:[%s3912_s24 + $0x8] sm:$0xf0] }
  0x73   : > { %651 = vmatpush.bf16.msrb.mxu0 %v2478_v5  ;;  %v2687_v5 = vld [vmem:[%s3912_s24 + $0xa0] sm:$0xf]  ;;  %v3470_v36 = vld [vmem:[%s3912_s24 + $0x84] sm:$0xf]  ;;  %v2673_v37 = vld [vmem:[%s3912_s24 + $0x88] sm:$0xf0]  ;;  %v2672_v45 = vor.u32 %v3471_v30, %v2671_v29 }
  0x74   : > { %664 = vmatpush.bf16.msrb.mxu1 %v2542_v9  ;;  %677 = vmatpush.bf16.msrb.mxu2 %v2482_v10  ;;  %v2625_v9 = vld [vmem:[%s3912_s24 + $0x28] sm:$0xf0]  ;;  %v3474_v10 = vld [vmem:[%s3912_s24 + $0xa4] sm:$0xf]  ;;  %v2793_v38 = vld [vmem:[%s3989_s30 + $0x70] sm:$0xf]  ;;  %v2676_v49 = vor.u32 %v3470_v36, %v2673_v37 }
  0x75   : > { %690 = vmatpush.bf16.msrb.mxu3 %v2546_v13  ;;  %v2615_v13 = vld [vmem:[%s3912_s24 + $0x10] sm:$0xf]  ;;  %v2692_v18 = vor.u32 %v3474_v10, %v2689_v11  ;;  %v3502_v39 = vld [vmem:[%s3989_s30 + $0x74] sm:$0xf0]  ;;  %v3501_v43 = vld [vmem:[%s3989_s30 + $0x74] sm:$0xf] }
  0x76   : > { %652 = vmatmul.bf16.vlgmr.msrb.gmra.mxu0 %v3885_v34  ;;  %v2795_v44 = vld [vmem:[%s3989_s30 + $0x78] sm:$0xf0]  ;;  %v3517_v47 = vld [vmem:[%s3989_s30 + $0xf4] sm:$0xf]  ;;  %v2794_v50 = vor.u32 %v3502_v39, %v2793_v38  ;;  %v2849_v55 = vld [vmem:[%s3989_s30 + $0xe0] sm:$0xf] }
  0x77   : > { %903 = vmatpush.bf16.msra.mxu0 %v2664_v14  ;;  %678 = vmatmul.bf16.vlgmr.msrb.gmra.mxu2 %v3885_v34  ;;  %v2688_v14 = vor.u32 %v3475_v7, %v2687_v5  ;;  %v2859_v48 = vld [vmem:[%s3989_s30 + $0xf8] sm:$0xf0]  ;;  %v3516_v57 = vld [vmem:[%s3989_s30 + $0xe4] sm:$0xf0]  ;;  %v2787_v59 = vld [vmem:[%s3989_s30 + $0x68] sm:$0xf0] }
  0x78   : > { %916 = vmatpush.bf16.msra.mxu1 %v2728_v15  ;;  %929 = vmatpush.bf16.msra.mxu2 %v2668_v16  ;;  %v2628_v15 = vor.u32 %v3458_v8, %v2625_v9  ;;  %v3457_v16 = vld [vmem:[%s3912_s24 + $0x14] sm:$0xf0]  ;;  %v2862_v56 = vor.u32 %v3517_v47, %v2859_v48  ;;  %v3515_v60 = vld [vmem:[%s3989_s30 + $0xe4] sm:$0xf]  ;;  %v2851_v61 = vld [vmem:[%s3989_s30 + $0xe8] sm:$0xf0]  ;;  %v2850_v63 = vor.u32 %v3516_v57, %v2849_v55 }
  0x79   : > { %942 = vmatpush.bf16.msra.mxu3 %v2732_v20  ;;  %665 = vmatmul.bf16.vlgmr.msrb.gmra.mxu1 %v3887_v35  ;;  %v3456_v20 = vld [vmem:[%s3912_s24 + $0x14] sm:$0xf]  ;;  %v2616_v24 = vor.u32 %v3457_v16, %v2615_v13  ;;  %v2841_v3 = vld [vmem:[%s3989_s30 + $0xd0] sm:$0xf]  ;;  %v2854_v4 = vor.u32 %v3515_v60, %v2851_v61  ;;  %v3514_v5 = vld [vmem:[%s3989_s30 + $0xd4] sm:$0xf0] }
  0x7a   : > { %691 = vmatmul.bf16.vlgmr.msrb.gmra.mxu3 %v3887_v35  ;;  %v2779_v7 = vld [vmem:[%s3989_s30 + $0x58] sm:$0xf0]  ;;  %v3513_v8 = vld [vmem:[%s3989_s30 + $0xd4] sm:$0xf]  ;;  %v2842_v11 = vor.u32 %v3514_v5, %v2841_v3  ;;  %v2769_v13 = vld [vmem:[%s3989_s30 + $0x40] sm:$0xf] }
  0x7b   : > { %904 = vmatpush.bf16.msra.mxu0 %v2656_v26  ;;  %v3455_v26 = vld [vmem:[%s3912_s24 + $0x4] sm:$0xf0]  ;;  %v2843_v9 = vld [vmem:[%s3989_s30 + $0xd8] sm:$0xf0]  ;;  %v3510_v29 = vld [vmem:[%s3989_s30 + $0xb4] sm:$0xf0] }
  0x7c   : > { %917 = vmatpush.bf16.msra.mxu1 %v2720_v27  ;;  %930 = vmatpush.bf16.msra.mxu2 %v2660_v28  ;;  %v2680_v27 = vor.u32 %v3473_v19, %v2679_v17  ;;  %v2620_v28 = vor.u32 %v3456_v20, %v2617_v21  ;;  %v2846_v16 = vor.u32 %v3513_v8, %v2843_v9  ;;  %v3512_v17 = vld [vmem:[%s3989_s30 + $0xc4] sm:$0xf0]  ;;  %v2771_v19 = vld [vmem:[%s3989_s30 + $0x48] sm:$0xf0]  ;;  %v3511_v20 = vld [vmem:[%s3989_s30 + $0xc4] sm:$0xf] }
  0x7d   : > { %943 = vmatpush.bf16.msra.mxu3 %v2724_v32  ;;  %v2684_v32 = vor.u32 %v3472_v22, %v2681_v23  ;;  %v2835_v21 = vld [vmem:[%s3989_s30 + $0xc8] sm:$0xf0]  ;;  %v3493_v30 = vld [vmem:[%s3989_s30 + $0x34] sm:$0xf]  ;;  %v2753_v39 = vld [vmem:[%s3989_s30 + $0x20] sm:$0xf] }
  0x7e   : > { %v2819_v47 = vld [vmem:[%s3989_s30 + $0xa8] sm:$0xf0]  ;;  %s3519_s9 = sshll.u32 %s4034_s7, 8  ;;  %v3506_v55 = vld [vmem:[%s3989_s30 + $0x94] sm:$0xf0]  ;;  %s1483_s13 = sadd.s32 5, %s3755_s8 }
  0x7f   : > { %905 = vmatpush.bf16.msra.mxu0 %v2648_v40  ;;  %v2857_v40 = vld [vmem:[%s3989_s30 + $0xf0] sm:$0xf]  ;;  %v2747_v57 = vld [vmem:[%s3989_s30 + $0x18] sm:$0xf0]  ;;  %v2737_v61 = vld [vmem:[%s3989_s30] sm:$0xf]  ;;  %s4066_s12 = scalar_lea.vmem %s4398_s3, %s3519_s9 }
  0x80   : > { %918 = vmatpush.bf16.msra.mxu1 %v2712_v41  ;;  %931 = vmatpush.bf16.msra.mxu2 %v2652_v42  ;;  %v2608_v41 = vor.u32 %v3455_v26, %v2607_v25  ;;  %v3518_v42 = vld [vmem:[%s3989_s30 + $0xf4] sm:$0xf0]  ;;  %v2761_v25 = vld [vmem:[%s3989_s30 + $0x30] sm:$0xf]  ;;  %v3487_v3 = vld [vmem:[%s3989_s30 + $0x4] sm:$0xf] }
  0x81   : > { %944 = vmatpush.bf16.msra.mxu3 %v2716_v46  ;;  %v2612_v46 = vor.u32 %v3454_v31, %v2609_v33  ;;  %v2858_v51 = vor.u32 %v3518_v42, %v2857_v40  ;;  %v3494_v26 = vld [vmem:[%s3989_s30 + $0x34] sm:$0xf0]  ;;  %v2763_v31 = vld [vmem:[%s3989_s30 + $0x38] sm:$0xf0]  ;;  %v3492_v40 = vld [vmem:[%s3989_s30 + $0x24] sm:$0xf0] }
  0x82   : > { %v2827_v33 = vld [vmem:[%s3989_s30 + $0xb8] sm:$0xf0]  ;;  %v2762_v36 = vor.u32 %v3494_v26, %v2761_v25  ;;  %v2766_v38 = vor.u32 %v3493_v30, %v2763_v31  ;;  %v2754_v48 = vor.u32 %v3492_v40, %v2753_v39  ;;  %v2739_v5 = vld [vmem:[%s3989_s30 + $0x8] sm:$0xf0]  ;;  %v2923_v8 = vld [vmem:[%s4066_s12 + $0x70] sm:$0xf] }
  0x83   : > { %906 = vmatpush.bf16.msra.mxu0 %v2640_v52  ;;  %v2798_v52 = vor.u32 %v3501_v43, %v2795_v44  ;;  %v3508_v43 = vld [vmem:[%s3989_s30 + $0xa4] sm:$0xf0]  ;;  %v3491_v44 = vld [vmem:[%s3989_s30 + $0x24] sm:$0xf]  ;;  %v3535_v9 = vld [vmem:[%s4066_s12 + $0x74] sm:$0xf0] }
  0x84   : > { %919 = vmatpush.bf16.msra.mxu1 %v2704_v53  ;;  %932 = vmatpush.bf16.msra.mxu2 %v2644_v54  ;;  %v2785_v53 = vld [vmem:[%s3989_s30 + $0x60] sm:$0xf]  ;;  %v3500_v54 = vld [vmem:[%s3989_s30 + $0x64] sm:$0xf0]  ;;  %v3548_v30 = vld [vmem:[%s4066_s12 + $0xe4] sm:$0xf] }
  0x85   : > { %945 = vmatpush.bf16.msra.mxu3 %v2708_v58  ;;  %v3499_v58 = vld [vmem:[%s3989_s30 + $0x64] sm:$0xf]  ;;  %v2786_v62 = vor.u32 %v3500_v54, %v2785_v53  ;;  %v2809_v53 = vld [vmem:[%s3989_s30 + $0x90] sm:$0xf]  ;;  %v2979_v25 = vld [vmem:[%s4066_s12 + $0xe0] sm:$0xf] }
  0x86   : > { %v2981_v31 = vld [vmem:[%s4066_s12 + $0xe8] sm:$0xf0]  ;;  %v2971_v39 = vld [vmem:[%s4066_s12 + $0xd0] sm:$0xf]  ;;  %s4111_s14 = sld [smem:[#allocation4 + %s1483_s13]]  ;;  %s1742_s19 = sadd.s32 6, %s3755_s8 }
  0x87   : > { %907 = vmatpush.bf16.msra.mxu0 %v2632_v0  ;;  %v2790_v0 = vor.u32 %v3499_v58, %v2787_v59  ;;  %v3505_v58 = vld [vmem:[%s3989_s30 + $0x94] sm:$0xf]  ;;  %v2811_v59 = vld [vmem:[%s3989_s30 + $0x98] sm:$0xf0]  ;;  %v2984_v40 = vor.u32 %v3548_v30, %v2981_v31  ;;  %v2867_v31 = vld [vmem:[%s4066_s12] sm:$0xf] }
  0x88   : > { %920 = vmatpush.bf16.msra.mxu1 %v2696_v1  ;;  %933 = vmatpush.bf16.msra.mxu2 %v2636_v2  ;;  %v2777_v1 = vld [vmem:[%s3989_s30 + $0x50] sm:$0xf]  ;;  %v3498_v2 = vld [vmem:[%s3989_s30 + $0x54] sm:$0xf0]  ;;  %s4188_s20 = sld [smem:[#allocation4 + %s1742_s19]]  ;;  %s2001_s24 = sadd.s32 7, %s3755_s8 }
  0x89   : > { %946 = vmatpush.bf16.msra.mxu3 %v2700_v6  ;;  %v3497_v6 = vld [vmem:[%s3989_s30 + $0x54] sm:$0xf]  ;;  %v2778_v10 = vor.u32 %v3498_v2, %v2777_v1  ;;  %v2801_v1 = vld [vmem:[%s3989_s30 + $0x80] sm:$0xf]  ;;  %v3504_v2 = vld [vmem:[%s3989_s30 + $0x84] sm:$0xf0] }
  0x8a   : > { %s4267_s8 = sld [smem:[#allocation4 + %s2001_s24]] }
  0x8b   : > { %908 = vmatpush.bf16.msra.mxu0 %v2624_v12  ;;  %v2782_v12 = vor.u32 %v3497_v6, %v2779_v7  ;;  %v3503_v6 = vld [vmem:[%s3989_s30 + $0x84] sm:$0xf]  ;;  %v2803_v7 = vld [vmem:[%s3989_s30 + $0x88] sm:$0xf0] }
  0x8c   : > { %921 = vmatpush.bf16.msra.mxu1 %v2688_v14  ;;  %934 = vmatpush.bf16.msra.mxu2 %v2628_v15  ;;  %v3496_v14 = vld [vmem:[%s3989_s30 + $0x44] sm:$0xf0]  ;;  %v2833_v15 = vld [vmem:[%s3989_s30 + $0xc0] sm:$0xf]  ;;  %s3552_s15 = sshll.u32 %s4111_s14, 8 }
  0x8d   : > { %947 = vmatpush.bf16.msra.mxu3 %v2692_v18  ;;  %v3495_v18 = vld [vmem:[%s3989_s30 + $0x44] sm:$0xf]  ;;  %v2770_v22 = vor.u32 %v3496_v14, %v2769_v13  ;;  %v2834_v23 = vor.u32 %v3512_v17, %v2833_v15  ;;  %v3534_v13 = vld [vmem:[%s4066_s12 + $0x74] sm:$0xf]  ;;  %v2925_v14 = vld [vmem:[%s4066_s12 + $0x78] sm:$0xf0]  ;;  %v2802_v15 = vor.u32 %v3504_v2, %v2801_v1  ;;  %s4143_s18 = scalar_lea.vmem %s4398_s3, %s3552_s15 }
  0x8e   : > { %v3550_v17 = vld [vmem:[%s4066_s12 + $0xf4] sm:$0xf]  ;;  %v3543_v1 = vld [vmem:[%s4066_s12 + $0xb4] sm:$0xf0]  ;;  %s3585_s21 = sshll.u32 %s4188_s20, 8 }
  0x8f   : > { %909 = vmatpush.bf16.msra.mxu0 %v2616_v24  ;;  %v2774_v24 = vor.u32 %v3495_v18, %v2771_v19  ;;  %v2989_v18 = vld [vmem:[%s4066_s12 + $0xf8] sm:$0xf0]  ;;  %v2806_v19 = vor.u32 %v3503_v6, %v2803_v7  ;;  %v3526_v2 = vld [vmem:[%s4066_s12 + $0x34] sm:$0xf]  ;;  %s4220_s1 = scalar_lea.vmem %s4398_s3, %s3585_s21 }
  0x90   : > { %922 = vmatpush.bf16.msra.mxu1 %v2680_v27  ;;  %935 = vmatpush.bf16.msra.mxu2 %v2620_v28  ;;  %v2825_v27 = vld [vmem:[%s3989_s30 + $0xb0] sm:$0xf]  ;;  %v2838_v28 = vor.u32 %v3511_v20, %v2835_v21  ;;  %v2924_v20 = vor.u32 %v3535_v9, %v2923_v8  ;;  %v2992_v26 = vor.u32 %v3550_v17, %v2989_v18  ;;  %v2883_v9 = vld [vmem:[%s4066_s12 + $0x20] sm:$0xf]  ;;  %v2949_v17 = vld [vmem:[%s4066_s12 + $0xa8] sm:$0xf0] }
  0x91   : > { %948 = vmatpush.bf16.msra.mxu3 %v2684_v32  ;;  %v3509_v32 = vld [vmem:[%s3989_s30 + $0xb4] sm:$0xf]  ;;  %v2826_v37 = vor.u32 %v3510_v29, %v2825_v27  ;;  %v3549_v27 = vld [vmem:[%s4066_s12 + $0xe4] sm:$0xf0]  ;;  %v2917_v29 = vld [vmem:[%s4066_s12 + $0x68] sm:$0xf0] }
  0x92   : > { %v2830_v42 = vor.u32 %v3509_v32, %v2827_v33  ;;  %v2980_v33 = vor.u32 %v3549_v27, %v2979_v25  ;;  %v3539_v25 = vld [vmem:[%s4066_s12 + $0x94] sm:$0xf0]  ;;  %v2877_v27 = vld [vmem:[%s4066_s12 + $0x18] sm:$0xf0]  ;;  %s3618_s25 = sshll.u32 %s4267_s8, 8 }
  0x93   : > { %910 = vmatpush.bf16.msra.mxu0 %v2608_v41  ;;  %v2817_v41 = vld [vmem:[%s3989_s30 + $0xa0] sm:$0xf]  ;;  %s4298_s28 = scalar_lea.vmem %s4398_s3, %s3618_s25 }
  0x94   : > { %923 = vmatpush.bf16.msra.mxu1 %v2672_v45  ;;  %936 = vmatpush.bf16.msra.mxu2 %v2612_v46  ;;  %v2755_v45 = vld [vmem:[%s3989_s30 + $0x28] sm:$0xf0]  ;;  %v3507_v46 = vld [vmem:[%s3989_s30 + $0xa4] sm:$0xf] }
  0x95   : > { %949 = vmatpush.bf16.msra.mxu3 %v2676_v49  ;;  %v2818_v49 = vor.u32 %v3508_v43, %v2817_v41  ;;  %v2822_v54 = vor.u32 %v3507_v46, %v2819_v47  ;;  %v3547_v41 = vld [vmem:[%s4066_s12 + $0xd4] sm:$0xf0]  ;;  %v2909_v43 = vld [vmem:[%s4066_s12 + $0x58] sm:$0xf0] }
  0x96   : > { %911 = vmatmul.bf16.vlgmr.msra.gmra.mxu0 %v3885_v34  ;;  %v2972_v47 = vor.u32 %v3547_v41, %v2971_v39  ;;  %v3520_v39 = vld [vmem:[%s4066_s12 + $0x4] sm:$0xf]  ;;  %v2869_v41 = vld [vmem:[%s4066_s12 + $0x8] sm:$0xf0] }
  0x97   : > { %1162 = vmatpush.bf16.msrb.mxu0 %v2794_v50  ;;  %937 = vmatmul.bf16.vlgmr.msra.gmra.mxu2 %v3885_v34  ;;  %v2758_v50 = vor.u32 %v3491_v44, %v2755_v45  ;;  %v3546_v44 = vld [vmem:[%s4066_s12 + $0xd4] sm:$0xf]  ;;  %v2973_v45 = vld [vmem:[%s4066_s12 + $0xd8] sm:$0xf0] }
  0x98   : > { %1175 = vmatpush.bf16.msrb.mxu1 %v2858_v51  ;;  %1188 = vmatpush.bf16.msrb.mxu2 %v2798_v52  ;;  %v2745_v51 = vld [vmem:[%s3989_s30 + $0x10] sm:$0xf]  ;;  %v3490_v52 = vld [vmem:[%s3989_s30 + $0x14] sm:$0xf0] }
  0x99   : > { %1201 = vmatpush.bf16.msrb.mxu3 %v2862_v56  ;;  %924 = vmatmul.bf16.vlgmr.msra.gmra.mxu1 %v3887_v35  ;;  %v3489_v56 = vld [vmem:[%s3989_s30 + $0x14] sm:$0xf]  ;;  %v2746_v60 = vor.u32 %v3490_v52, %v2745_v51  ;;  %v2963_v51 = vld [vmem:[%s4066_s12 + $0xc0] sm:$0xf]  ;;  %v2976_v52 = vor.u32 %v3546_v44, %v2973_v45  ;;  %v3053_v44 = vld [vmem:[%s4143_s18 + $0x70] sm:$0xf] }
  0x9a   : > { %950 = vmatmul.bf16.vlgmr.msra.gmra.mxu3 %v3887_v35  ;;  %v3568_v45 = vld [vmem:[%s4143_s18 + $0x74] sm:$0xf0] }
  0x9b   : > { %1163 = vmatpush.bf16.msrb.mxu0 %v2786_v62  ;;  %v3488_v62 = vld [vmem:[%s3989_s30 + $0x4] sm:$0xf0] }
  0x9c   : > { %1176 = vmatpush.bf16.msrb.mxu1 %v2850_v63  ;;  %1189 = vmatpush.bf16.msrb.mxu2 %v2790_v0  ;;  %v2810_v63 = vor.u32 %v3506_v55, %v2809_v53  ;;  %v2750_v0 = vor.u32 %v3489_v56, %v2747_v57  ;;  %v3545_v53 = vld [vmem:[%s4066_s12 + $0xc4] sm:$0xf0]  ;;  %v2901_v55 = vld [vmem:[%s4066_s12 + $0x48] sm:$0xf0]  ;;  %v3544_v56 = vld [vmem:[%s4066_s12 + $0xc4] sm:$0xf] }
  0x9d   : > { %1202 = vmatpush.bf16.msrb.mxu3 %v2854_v4  ;;  %v2814_v4 = vor.u32 %v3505_v58, %v2811_v59  ;;  %v2965_v57 = vld [vmem:[%s4066_s12 + $0xc8] sm:$0xf0]  ;;  %v2964_v59 = vor.u32 %v3545_v53, %v2963_v51  ;;  %v3583_v53 = vld [vmem:[%s4143_s18 + $0xf4] sm:$0xf] }
  0x9f   : > { %1164 = vmatpush.bf16.msrb.mxu0 %v2778_v10  ;;  %v2987_v10 = vld [vmem:[%s4066_s12 + $0xf0] sm:$0xf] }
  0xa0   : > { %1177 = vmatpush.bf16.msrb.mxu1 %v2842_v11  ;;  %1190 = vmatpush.bf16.msrb.mxu2 %v2782_v12  ;;  %v2738_v11 = vor.u32 %v3488_v62, %v2737_v61  ;;  %v3551_v12 = vld [vmem:[%s4066_s12 + $0xf4] sm:$0xf0]  ;;  %v2891_v61 = vld [vmem:[%s4066_s12 + $0x30] sm:$0xf] }
  0xa1   : > { %1203 = vmatpush.bf16.msrb.mxu3 %v2846_v16  ;;  %v2742_v16 = vor.u32 %v3487_v3, %v2739_v5  ;;  %v2988_v21 = vor.u32 %v3551_v12, %v2987_v10  ;;  %v3527_v62 = vld [vmem:[%s4066_s12 + $0x34] sm:$0xf0]  ;;  %v2893_v3 = vld [vmem:[%s4066_s12 + $0x38] sm:$0xf0]  ;;  %v3525_v10 = vld [vmem:[%s4066_s12 + $0x24] sm:$0xf0] }
  0xa2   : > { %v2957_v5 = vld [vmem:[%s4066_s12 + $0xb8] sm:$0xf0]  ;;  %v2892_v6 = vor.u32 %v3527_v62, %v2891_v61  ;;  %v2896_v8 = vor.u32 %v3526_v2, %v2893_v3  ;;  %v2884_v18 = vor.u32 %v3525_v10, %v2883_v9  ;;  %v3109_v61 = vld [vmem:[%s4143_s18 + $0xe0] sm:$0xf]  ;;  %v3581_v2 = vld [vmem:[%s4143_s18 + $0xe4] sm:$0xf] }
  0xa3   : > { %1165 = vmatpush.bf16.msrb.mxu0 %v2770_v22  ;;  %v2928_v22 = vor.u32 %v3534_v13, %v2925_v14  ;;  %v3541_v13 = vld [vmem:[%s4066_s12 + $0xa4] sm:$0xf0]  ;;  %v3524_v14 = vld [vmem:[%s4066_s12 + $0x24] sm:$0xf]  ;;  %v3111_v3 = vld [vmem:[%s4143_s18 + $0xe8] sm:$0xf0] }
  0xa4   : > { %1178 = vmatpush.bf16.msrb.mxu1 %v2834_v23  ;;  %1191 = vmatpush.bf16.msrb.mxu2 %v2774_v24  ;;  %v2915_v23 = vld [vmem:[%s4066_s12 + $0x60] sm:$0xf]  ;;  %v3533_v24 = vld [vmem:[%s4066_s12 + $0x64] sm:$0xf0]  ;;  %v3101_v9 = vld [vmem:[%s4143_s18 + $0xd0] sm:$0xf]  ;;  %v3114_v10 = vor.u32 %v3581_v2, %v3111_v3 }
  0xa5   : > { %1204 = vmatpush.bf16.msrb.mxu3 %v2838_v28  ;;  %v3532_v28 = vld [vmem:[%s4066_s12 + $0x64] sm:$0xf]  ;;  %v2916_v32 = vor.u32 %v3533_v24, %v2915_v23  ;;  %v2939_v23 = vld [vmem:[%s4066_s12 + $0x90] sm:$0xf]  ;;  %v2997_v3 = vld [vmem:[%s4143_s18] sm:$0xf] }
  0xa7   : > { %1166 = vmatpush.bf16.msrb.mxu0 %v2762_v36  ;;  %v2920_v36 = vor.u32 %v3532_v28, %v2917_v29  ;;  %v3538_v28 = vld [vmem:[%s4066_s12 + $0x94] sm:$0xf]  ;;  %v2941_v29 = vld [vmem:[%s4066_s12 + $0x98] sm:$0xf0] }
  0xa8   : > { %1179 = vmatpush.bf16.msrb.mxu1 %v2826_v37  ;;  %1192 = vmatpush.bf16.msrb.mxu2 %v2766_v38  ;;  %v2907_v37 = vld [vmem:[%s4066_s12 + $0x50] sm:$0xf]  ;;  %v3531_v38 = vld [vmem:[%s4066_s12 + $0x54] sm:$0xf0] }
  0xa9   : > { %1205 = vmatpush.bf16.msrb.mxu3 %v2830_v42  ;;  %v3530_v42 = vld [vmem:[%s4066_s12 + $0x54] sm:$0xf]  ;;  %v2908_v46 = vor.u32 %v3531_v38, %v2907_v37  ;;  %v2931_v37 = vld [vmem:[%s4066_s12 + $0x80] sm:$0xf]  ;;  %v3537_v38 = vld [vmem:[%s4066_s12 + $0x84] sm:$0xf0] }
  0xaa   : > { %v2932_v51 = vor.u32 %v3537_v38, %v2931_v37  ;;  %v3576_v37 = vld [vmem:[%s4143_s18 + $0xb4] sm:$0xf0]  ;;  %v3559_v38 = vld [vmem:[%s4143_s18 + $0x34] sm:$0xf] }
  0xab   : > { %1167 = vmatpush.bf16.msrb.mxu0 %v2754_v48  ;;  %v2912_v48 = vor.u32 %v3530_v42, %v2909_v43  ;;  %v3536_v42 = vld [vmem:[%s4066_s12 + $0x84] sm:$0xf]  ;;  %v2933_v43 = vld [vmem:[%s4066_s12 + $0x88] sm:$0xf0] }
  0xac   : > { %1180 = vmatpush.bf16.msrb.mxu1 %v2818_v49  ;;  %1193 = vmatpush.bf16.msrb.mxu2 %v2758_v50  ;;  %v2899_v49 = vld [vmem:[%s4066_s12 + $0x40] sm:$0xf]  ;;  %v3529_v50 = vld [vmem:[%s4066_s12 + $0x44] sm:$0xf0] }
  0xad   : > { %1206 = vmatpush.bf16.msrb.mxu3 %v2822_v54  ;;  %v3528_v54 = vld [vmem:[%s4066_s12 + $0x44] sm:$0xf]  ;;  %v2900_v58 = vor.u32 %v3529_v50, %v2899_v49  ;;  %v3567_v49 = vld [vmem:[%s4143_s18 + $0x74] sm:$0xf]  ;;  %v3055_v50 = vld [vmem:[%s4143_s18 + $0x78] sm:$0xf0] }
  0xaf   : > { %1168 = vmatpush.bf16.msrb.mxu0 %v2746_v60  ;;  %v2904_v60 = vor.u32 %v3528_v54, %v2901_v55  ;;  %v3119_v54 = vld [vmem:[%s4143_s18 + $0xf8] sm:$0xf0]  ;;  %v2936_v55 = vor.u32 %v3536_v42, %v2933_v43 }
  0xb0   : > { %1181 = vmatpush.bf16.msrb.mxu1 %v2810_v63  ;;  %1194 = vmatpush.bf16.msrb.mxu2 %v2750_v0  ;;  %v2955_v63 = vld [vmem:[%s4066_s12 + $0xb0] sm:$0xf]  ;;  %v2968_v0 = vor.u32 %v3544_v56, %v2965_v57  ;;  %v3054_v56 = vor.u32 %v3568_v45, %v3053_v44  ;;  %v3122_v62 = vor.u32 %v3583_v53, %v3119_v54  ;;  %v3013_v45 = vld [vmem:[%s4143_s18 + $0x20] sm:$0xf]  ;;  %v3079_v53 = vld [vmem:[%s4143_s18 + $0xa8] sm:$0xf0] }
  0xb1   : > { %1207 = vmatpush.bf16.msrb.mxu3 %v2814_v4  ;;  %v3542_v4 = vld [vmem:[%s4066_s12 + $0xb4] sm:$0xf]  ;;  %v2956_v7 = vor.u32 %v3543_v1, %v2955_v63  ;;  %v3582_v63 = vld [vmem:[%s4143_s18 + $0xe4] sm:$0xf0]  ;;  %v3047_v1 = vld [vmem:[%s4143_s18 + $0x68] sm:$0xf0] }
  0xb2   : > { %v2960_v12 = vor.u32 %v3542_v4, %v2957_v5  ;;  %v3110_v5 = vor.u32 %v3582_v63, %v3109_v61  ;;  %v3572_v61 = vld [vmem:[%s4143_s18 + $0x94] sm:$0xf0]  ;;  %v3007_v63 = vld [vmem:[%s4143_s18 + $0x18] sm:$0xf0] }
  0xb3   : > { %1169 = vmatpush.bf16.msrb.mxu0 %v2738_v11  ;;  %v2947_v11 = vld [vmem:[%s4066_s12 + $0xa0] sm:$0xf] }
  0xb4   : > { %1182 = vmatpush.bf16.msrb.mxu1 %v2802_v15  ;;  %1195 = vmatpush.bf16.msrb.mxu2 %v2742_v16  ;;  %v2885_v15 = vld [vmem:[%s4066_s12 + $0x28] sm:$0xf0]  ;;  %v3540_v16 = vld [vmem:[%s4066_s12 + $0xa4] sm:$0xf] }
  0xb5   : > { %1208 = vmatpush.bf16.msrb.mxu3 %v2806_v19  ;;  %v2948_v19 = vor.u32 %v3541_v13, %v2947_v11  ;;  %v2952_v24 = vor.u32 %v3540_v16, %v2949_v17  ;;  %v3580_v11 = vld [vmem:[%s4143_s18 + $0xd4] sm:$0xf0]  ;;  %v3039_v13 = vld [vmem:[%s4143_s18 + $0x58] sm:$0xf0] }
  0xb6   : > { %1170 = vmatmul.bf16.vlgmr.msrb.gmra.mxu0 %v3885_v34  ;;  %v3102_v17 = vor.u32 %v3580_v11, %v3101_v9  ;;  %v3553_v9 = vld [vmem:[%s4143_s18 + $0x4] sm:$0xf] }
  0xb7   : > { %1421 = vmatpush.bf16.msra.mxu0 %v2924_v20  ;;  %1196 = vmatmul.bf16.vlgmr.msrb.gmra.mxu2 %v3885_v34  ;;  %v2888_v20 = vor.u32 %v3524_v14, %v2885_v15  ;;  %v3579_v14 = vld [vmem:[%s4143_s18 + $0xd4] sm:$0xf]  ;;  %v3103_v15 = vld [vmem:[%s4143_s18 + $0xd8] sm:$0xf0] }
  0xb8   : > { %1434 = vmatpush.bf16.msra.mxu1 %v2988_v21  ;;  %1447 = vmatpush.bf16.msra.mxu2 %v2928_v22  ;;  %v2875_v21 = vld [vmem:[%s4066_s12 + $0x10] sm:$0xf]  ;;  %v3523_v22 = vld [vmem:[%s4066_s12 + $0x14] sm:$0xf0] }
  0xb9   : > { %1460 = vmatpush.bf16.msra.mxu3 %v2992_v26  ;;  %1183 = vmatmul.bf16.vlgmr.msrb.gmra.mxu1 %v3887_v35  ;;  %v3522_v26 = vld [vmem:[%s4066_s12 + $0x14] sm:$0xf]  ;;  %v2876_v30 = vor.u32 %v3523_v22, %v2875_v21  ;;  %v3093_v21 = vld [vmem:[%s4143_s18 + $0xc0] sm:$0xf]  ;;  %v3106_v22 = vor.u32 %v3579_v14, %v3103_v15  ;;  %v3063_v14 = vld [vmem:[%s4143_s18 + $0x88] sm:$0xf0] }
  0xba   : > { %1209 = vmatmul.bf16.vlgmr.msrb.gmra.mxu3 %v3887_v35  ;;  %v3183_v15 = vld [vmem:[%s4220_s1 + $0x70] sm:$0xf] }
  0xbb   : > { %1422 = vmatpush.bf16.msra.mxu0 %v2916_v32  ;;  %v3521_v32 = vld [vmem:[%s4066_s12 + $0x4] sm:$0xf0] }
  0xbc   : > { %1435 = vmatpush.bf16.msra.mxu1 %v2980_v33  ;;  %1448 = vmatpush.bf16.msra.mxu2 %v2920_v36  ;;  %v2940_v33 = vor.u32 %v3539_v25, %v2939_v23  ;;  %v2880_v36 = vor.u32 %v3522_v26, %v2877_v27  ;;  %v3578_v23 = vld [vmem:[%s4143_s18 + $0xc4] sm:$0xf0]  ;;  %v3031_v25 = vld [vmem:[%s4143_s18 + $0x48] sm:$0xf0]  ;;  %v3577_v26 = vld [vmem:[%s4143_s18 + $0xc4] sm:$0xf] }
  0xbd   : > { %1461 = vmatpush.bf16.msra.mxu3 %v2984_v40  ;;  %v2944_v40 = vor.u32 %v3538_v28, %v2941_v29  ;;  %v3095_v27 = vld [vmem:[%s4143_s18 + $0xc8] sm:$0xf0]  ;;  %v3094_v29 = vor.u32 %v3578_v23, %v3093_v21  ;;  %v3600_v21 = vld [vmem:[%s4220_s1 + $0x74] sm:$0xf] }
  0xbf   : > { %1423 = vmatpush.bf16.msra.mxu0 %v2908_v46  ;;  %v3117_v46 = vld [vmem:[%s4143_s18 + $0xf0] sm:$0xf] }
  0xc0   : > { %1436 = vmatpush.bf16.msra.mxu1 %v2972_v47  ;;  %1449 = vmatpush.bf16.msra.mxu2 %v2912_v48  ;;  %v2868_v47 = vor.u32 %v3521_v32, %v2867_v31  ;;  %v3584_v48 = vld [vmem:[%s4143_s18 + $0xf4] sm:$0xf0]  ;;  %v3021_v31 = vld [vmem:[%s4143_s18 + $0x30] sm:$0xf] }
  0xc1   : > { %1462 = vmatpush.bf16.msra.mxu3 %v2976_v52  ;;  %v2872_v52 = vor.u32 %v3520_v39, %v2869_v41  ;;  %v3118_v57 = vor.u32 %v3584_v48, %v3117_v46  ;;  %v3560_v32 = vld [vmem:[%s4143_s18 + $0x34] sm:$0xf0]  ;;  %v3023_v39 = vld [vmem:[%s4143_s18 + $0x38] sm:$0xf0]  ;;  %v3558_v46 = vld [vmem:[%s4143_s18 + $0x24] sm:$0xf0] }
  0xc2   : > { %v3087_v41 = vld [vmem:[%s4143_s18 + $0xb8] sm:$0xf0]  ;;  %v3022_v42 = vor.u32 %v3560_v32, %v3021_v31  ;;  %v3026_v44 = vor.u32 %v3559_v38, %v3023_v39  ;;  %v3014_v54 = vor.u32 %v3558_v46, %v3013_v45  ;;  %v3239_v38 = vld [vmem:[%s4220_s1 + $0xe0] sm:$0xf]  ;;  %v3614_v45 = vld [vmem:[%s4220_s1 + $0xe4] sm:$0xf] }
  0xc3   : > { %1424 = vmatpush.bf16.msra.mxu0 %v2900_v58  ;;  %v3058_v58 = vor.u32 %v3567_v49, %v3055_v50  ;;  %v3574_v49 = vld [vmem:[%s4143_s18 + $0xa4] sm:$0xf0]  ;;  %v3557_v50 = vld [vmem:[%s4143_s18 + $0x24] sm:$0xf]  ;;  %v3241_v46 = vld [vmem:[%s4220_s1 + $0xe8] sm:$0xf0] }
  0xc4   : > { %1437 = vmatpush.bf16.msra.mxu1 %v2964_v59  ;;  %1450 = vmatpush.bf16.msra.mxu2 %v2904_v60  ;;  %v3045_v59 = vld [vmem:[%s4143_s18 + $0x60] sm:$0xf]  ;;  %v3566_v60 = vld [vmem:[%s4143_s18 + $0x64] sm:$0xf0] }
  0xc5   : > { %1463 = vmatpush.bf16.msra.mxu3 %v2968_v0  ;;  %v3565_v0 = vld [vmem:[%s4143_s18 + $0x64] sm:$0xf]  ;;  %v3046_v4 = vor.u32 %v3566_v60, %v3045_v59  ;;  %v3069_v59 = vld [vmem:[%s4143_s18 + $0x90] sm:$0xf] }
  0xc7   : > { %1425 = vmatpush.bf16.msra.mxu0 %v2892_v6  ;;  %v3050_v6 = vor.u32 %v3565_v0, %v3047_v1  ;;  %v3571_v0 = vld [vmem:[%s4143_s18 + $0x94] sm:$0xf]  ;;  %v3071_v1 = vld [vmem:[%s4143_s18 + $0x98] sm:$0xf0] }
  0xc8   : > { %1438 = vmatpush.bf16.msra.mxu1 %v2956_v7  ;;  %1451 = vmatpush.bf16.msra.mxu2 %v2896_v8  ;;  %v3037_v7 = vld [vmem:[%s4143_s18 + $0x50] sm:$0xf]  ;;  %v3564_v8 = vld [vmem:[%s4143_s18 + $0x54] sm:$0xf0]  ;;  %v3074_v11 = vor.u32 %v3571_v0, %v3071_v1  ;;  %v3233_v0 = vld [vmem:[%s4220_s1 + $0xd8] sm:$0xf0] }
  0xc9   : > { %1464 = vmatpush.bf16.msra.mxu3 %v2960_v12  ;;  %v3563_v12 = vld [vmem:[%s4143_s18 + $0x54] sm:$0xf]  ;;  %v3038_v16 = vor.u32 %v3564_v8, %v3037_v7  ;;  %v3061_v7 = vld [vmem:[%s4143_s18 + $0x80] sm:$0xf]  ;;  %v3570_v8 = vld [vmem:[%s4143_s18 + $0x84] sm:$0xf0] }
  0xcb   : > { %1426 = vmatpush.bf16.msra.mxu0 %v2884_v18  ;;  %v3042_v18 = vor.u32 %v3563_v12, %v3039_v13  ;;  %v2999_v12 = vld [vmem:[%s4143_s18 + $0x8] sm:$0xf0]  ;;  %v3569_v13 = vld [vmem:[%s4143_s18 + $0x84] sm:$0xf] }
  0xcc   : > { %1439 = vmatpush.bf16.msra.mxu1 %v2948_v19  ;;  %1452 = vmatpush.bf16.msra.mxu2 %v2888_v20  ;;  %v3029_v19 = vld [vmem:[%s4143_s18 + $0x40] sm:$0xf]  ;;  %v3562_v20 = vld [vmem:[%s4143_s18 + $0x44] sm:$0xf0] }
  0xcd   : > { %1465 = vmatpush.bf16.msra.mxu3 %v2952_v24  ;;  %v3561_v24 = vld [vmem:[%s4143_s18 + $0x44] sm:$0xf]  ;;  %v3030_v28 = vor.u32 %v3562_v20, %v3029_v19  ;;  %v3617_v20 = vld [vmem:[%s4220_s1 + $0xf4] sm:$0xf0] }
  0xcf   : > { %1427 = vmatpush.bf16.msra.mxu0 %v2876_v30  ;;  %v3034_v30 = vor.u32 %v3561_v24, %v3031_v25  ;;  %v3062_v24 = vor.u32 %v3570_v8, %v3061_v7  ;;  %v3002_v25 = vor.u32 %v3553_v9, %v2999_v12  ;;  %v3159_v7 = vld [vmem:[%s4220_s1 + $0x40] sm:$0xf]  ;;  %v3595_v8 = vld [vmem:[%s4220_s1 + $0x44] sm:$0xf0]  ;;  %v3594_v12 = vld [vmem:[%s4220_s1 + $0x44] sm:$0xf] }
  0xd0   : > { %1440 = vmatpush.bf16.msra.mxu1 %v2940_v33  ;;  %1453 = vmatpush.bf16.msra.mxu2 %v2880_v36  ;;  %v3085_v33 = vld [vmem:[%s4143_s18 + $0xb0] sm:$0xf]  ;;  %v3098_v36 = vor.u32 %v3577_v26, %v3095_v27  ;;  %v3616_v26 = vld [vmem:[%s4220_s1 + $0xf4] sm:$0xf]  ;;  %v3249_v27 = vld [vmem:[%s4220_s1 + $0xf8] sm:$0xf0] }
  0xd1   : > { %1466 = vmatpush.bf16.msra.mxu3 %v2944_v40  ;;  %v3575_v40 = vld [vmem:[%s4143_s18 + $0xb4] sm:$0xf]  ;;  %v3086_v43 = vor.u32 %v3576_v37, %v3085_v33  ;;  %v3599_v37 = vld [vmem:[%s4220_s1 + $0x64] sm:$0xf0]  ;;  %v3223_v9 = vld [vmem:[%s4220_s1 + $0xc0] sm:$0xf] }
  0xd2   : > { %v3090_v48 = vor.u32 %v3575_v40, %v3087_v41  ;;  %v3252_v41 = vor.u32 %v3616_v26, %v3249_v27  ;;  %v3153_v26 = vld [vmem:[%s4220_s1 + $0x38] sm:$0xf0]  ;;  %v3608_v27 = vld [vmem:[%s4220_s1 + $0xb4] sm:$0xf] }
  0xd3   : > { %1428 = vmatpush.bf16.msra.mxu0 %v2868_v47  ;;  %v3077_v47 = vld [vmem:[%s4143_s18 + $0xa0] sm:$0xf] }
  0xd4   : > { %1441 = vmatpush.bf16.msra.mxu1 %v2932_v51  ;;  %1454 = vmatpush.bf16.msra.mxu2 %v2872_v52  ;;  %v3015_v51 = vld [vmem:[%s4143_s18 + $0x28] sm:$0xf0]  ;;  %v3573_v52 = vld [vmem:[%s4143_s18 + $0xa4] sm:$0xf] }
  0xd5   : > { %1467 = vmatpush.bf16.msra.mxu3 %v2936_v55  ;;  %v3078_v55 = vor.u32 %v3574_v49, %v3077_v47  ;;  %v3082_v60 = vor.u32 %v3573_v52, %v3079_v53 }
  0xd6   : > { %1429 = vmatmul.bf16.vlgmr.msra.gmra.mxu0 %v3885_v34 }
  0xd7   : > { %1680 = vmatpush.bf16.msrb.mxu0 %v3054_v56  ;;  %1455 = vmatmul.bf16.vlgmr.msra.gmra.mxu2 %v3885_v34  ;;  %v3018_v56 = vor.u32 %v3557_v50, %v3015_v51  ;;  %v3167_v50 = vld [vmem:[%s4220_s1 + $0x50] sm:$0xf]  ;;  %v3597_v51 = vld [vmem:[%s4220_s1 + $0x54] sm:$0xf0] }
  0xd8   : > { %1693 = vmatpush.bf16.msrb.mxu1 %v3118_v57  ;;  %1706 = vmatpush.bf16.msrb.mxu2 %v3058_v58  ;;  %v3005_v57 = vld [vmem:[%s4143_s18 + $0x10] sm:$0xf]  ;;  %v3556_v58 = vld [vmem:[%s4143_s18 + $0x14] sm:$0xf0]  ;;  %v3168_v1 = vor.u32 %v3597_v51, %v3167_v50 }
  0xd9   : > { %1719 = vmatpush.bf16.msrb.mxu3 %v3122_v62  ;;  %1442 = vmatmul.bf16.vlgmr.msra.gmra.mxu1 %v3887_v35  ;;  %v3555_v62 = vld [vmem:[%s4143_s18 + $0x14] sm:$0xf]  ;;  %v3006_v2 = vor.u32 %v3556_v58, %v3005_v57  ;;  %v3135_v50 = vld [vmem:[%s4220_s1 + $0x10] sm:$0xf]  ;;  %v3589_v51 = vld [vmem:[%s4220_s1 + $0x14] sm:$0xf0] }
  0xda   : > { %1468 = vmatmul.bf16.vlgmr.msra.gmra.mxu3 %v3887_v35 }
  0xdb   : > { %1681 = vmatpush.bf16.msrb.mxu0 %v3046_v4  ;;  %v3554_v4 = vld [vmem:[%s4143_s18 + $0x4] sm:$0xf0] }
  0xdc   : > { %1694 = vmatpush.bf16.msrb.mxu1 %v3110_v5  ;;  %1707 = vmatpush.bf16.msrb.mxu2 %v3050_v6  ;;  %v3070_v5 = vor.u32 %v3572_v61, %v3069_v59  ;;  %v3010_v6 = vor.u32 %v3555_v62, %v3007_v63  ;;  %v2998_v19 = vor.u32 %v3554_v4, %v2997_v3  ;;  %v3169_v61 = vld [vmem:[%s4220_s1 + $0x58] sm:$0xf0]  ;;  %v3612_v63 = vld [vmem:[%s4220_s1 + $0xd4] sm:$0xf] }
  0xdd   : > { %1720 = vmatpush.bf16.msrb.mxu3 %v3114_v10  ;;  %v406_v10 = vpop.f32.mrf.mxu1  ;;  %v3244_v59 = vor.u32 %v3614_v45, %v3241_v46  ;;  %v3606_v45 = vld [vmem:[%s4220_s1 + $0xa4] sm:$0xf]  ;;  %v3209_v46 = vld [vmem:[%s4220_s1 + $0xa8] sm:$0xf0] }
  0xdf   : > { %1682 = vmatpush.bf16.msrb.mxu0 %v3038_v16  ;;  %v3601_v16 = vld [vmem:[%s4220_s1 + $0x74] sm:$0xf0] }
  0xe0   : > { %1695 = vmatpush.bf16.msrb.mxu1 %v3102_v17  ;;  %1708 = vmatpush.bf16.msrb.mxu2 %v3042_v18  ;;  %v3247_v17 = vld [vmem:[%s4220_s1 + $0xf0] sm:$0xf]  ;;  %v393_v18 = vpop.f32.mrf.mxu0  ;;  %v419_v31 = vpop.f32.mrf.mxu2 }
  0xe1   : > { %1721 = vmatpush.bf16.msrb.mxu3 %v3106_v22  ;;  %v3185_v22 = vld [vmem:[%s4220_s1 + $0x78] sm:$0xf0]  ;;  %v407_v23 = vadd.f32 %v406_v10, %v393_v18  ;;  %v432_v32 = vpop.f32.mrf.mxu3  ;;  %v3248_v33 = vor.u32 %v3617_v20, %v3247_v17  ;;  %v3236_v10 = vor.u32 %v3612_v63, %v3233_v0  ;;  %v3151_v20 = vld [vmem:[%s4220_s1 + $0x30] sm:$0xf]  ;;  %v3127_v63 = vld [vmem:[%s4220_s1] sm:$0xf] }
  0xe2   : > { %v433_v39 = vadd.f32 %v432_v32, %v419_v31 }
  0xe3   : > { %1683 = vmatpush.bf16.msrb.mxu0 %v3030_v28  ;;  %v3066_v28 = vor.u32 %v3569_v13, %v3063_v14  ;;  %v436_v40 = vmax.f32 %v407_v23, 0.0  ;;  %v3161_v13 = vld [vmem:[%s4220_s1 + $0x48] sm:$0xf0]  ;;  %v3610_v14 = vld [vmem:[%s4220_s1 + $0xc4] sm:$0xf] }
  0xe4   : > { %1696 = vmatpush.bf16.msrb.mxu1 %v3094_v29  ;;  %1709 = vmatpush.bf16.msrb.mxu2 %v3034_v30  ;;  %v3184_v29 = vor.u32 %v3601_v16, %v3183_v15  ;;  %v3175_v30 = vld [vmem:[%s4220_s1 + $0x60] sm:$0xf]  ;;  %v437_v47 = vmax.f32 %v433_v39, 0.0  ;;  %v3225_v15 = vld [vmem:[%s4220_s1 + $0xc8] sm:$0xf0]  ;;  %v3160_v16 = vor.u32 %v3595_v8, %v3159_v7 }
  0xe5   : > { %1722 = vmatpush.bf16.msrb.mxu3 %v3098_v36  ;;  %v3188_v36 = vor.u32 %v3600_v21, %v3185_v22  ;;  %v3176_v49 = vor.u32 %v3599_v37, %v3175_v30  ;;  %v438_v57 = vmin.f32 %v436_v40, 1.0  ;;  %v3593_v21 = vld [vmem:[%s4220_s1 + $0x34] sm:$0xf0]  ;;  %v3215_v22 = vld [vmem:[%s4220_s1 + $0xb0] sm:$0xf]  ;;  %v3228_v23 = vor.u32 %v3610_v14, %v3225_v15 }
  0xe6   : > { %v3152_v30 = vor.u32 %v3593_v21, %v3151_v20  ;;  %v3591_v37 = vld [vmem:[%s4220_s1 + $0x24] sm:$0xf0]  ;;  %v3602_v14 = vld [vmem:[%s4220_s1 + $0x84] sm:$0xf]  ;;  %v3193_v15 = vld [vmem:[%s4220_s1 + $0x88] sm:$0xf0] }
  0xe7   : > { %1684 = vmatpush.bf16.msrb.mxu0 %v3022_v42  ;;  %v3615_v42 = vld [vmem:[%s4220_s1 + $0xe4] sm:$0xf0]  ;;  %v3650_v20 = vld [vmem:[%s4298_s28 + $0xf4] sm:$0xf0] }
  0xe8   : > { %1697 = vmatpush.bf16.msrb.mxu1 %v3086_v43  ;;  %1710 = vmatpush.bf16.msrb.mxu2 %v3026_v44  ;;  %v3598_v43 = vld [vmem:[%s4220_s1 + $0x64] sm:$0xf]  ;;  %v3177_v44 = vld [vmem:[%s4220_s1 + $0x68] sm:$0xf0]  ;;  %v3240_v52 = vor.u32 %v3615_v42, %v3239_v38  ;;  %v395_v58 = vpop.f32.mrf.mxu0  ;;  %v3207_v38 = vld [vmem:[%s4220_s1 + $0xa0] sm:$0xf] }
  0xe9   : > { %1723 = vmatpush.bf16.msrb.mxu3 %v3090_v48  ;;  %v408_v48 = vpop.f32.mrf.mxu1  ;;  %v3180_v53 = vor.u32 %v3598_v43, %v3177_v44  ;;  %v434_v3 = vpop.f32.mrf.mxu3  ;;  %v3590_v42 = vld [vmem:[%s4220_s1 + $0x24] sm:$0xf]  ;;  %v3145_v43 = vld [vmem:[%s4220_s1 + $0x28] sm:$0xf0]  ;;  %v3212_v58 = vor.u32 %v3606_v45, %v3209_v46 }
  0xea   : > { %v3136_v3 = vor.u32 %v3589_v51, %v3135_v50  ;;  %v3646_v51 = vld [vmem:[%s4298_s28 + $0xd4] sm:$0xf0] }
  0xeb   : > { %1685 = vmatpush.bf16.msrb.mxu0 %v3014_v54  ;;  %v439_v54 = vmin.f32 %v437_v47, 1.0 }
  0xec   : > { %1698 = vmatpush.bf16.msrb.mxu1 %v3078_v55  ;;  %1711 = vmatpush.bf16.msrb.mxu2 %v3018_v56  ;;  %v3231_v55 = vld [vmem:[%s4220_s1 + $0xd0] sm:$0xf]  ;;  %v3613_v56 = vld [vmem:[%s4220_s1 + $0xd4] sm:$0xf0] }
  0xed   : > { %1724 = vmatpush.bf16.msrb.mxu3 %v3082_v60  ;;  %v3596_v60 = vld [vmem:[%s4220_s1 + $0x54] sm:$0xf]  ;;  %v442_v62 = vrot.slane %v439_v54, 4  ;;  %v3232_v4 = vor.u32 %v3613_v56, %v3231_v55  ;;  %v3148_v54 = vor.u32 %v3590_v42, %v3145_v43  ;;  %v3199_v55 = vld [vmem:[%s4220_s1 + $0x90] sm:$0xf] }
  0xee   : > { %v3605_v56 = vld [vmem:[%s4220_s1 + $0x94] sm:$0xf0]  ;;  %v3647_v42 = vld [vmem:[%s4298_s28 + $0xe4] sm:$0xf]  ;;  %v3371_v43 = vld [vmem:[%s4298_s28 + $0xe8] sm:$0xf0] }
  0xef   : > { %1686 = vmatpush.bf16.msrb.mxu0 %v3006_v2  ;;  %v421_v2 = vpop.f32.mrf.mxu2  ;;  %v3200_v7 = vor.u32 %v3605_v56, %v3199_v55  ;;  %v3374_v50 = vor.u32 %v3647_v42, %v3371_v43  ;;  %v3363_v55 = vld [vmem:[%s4298_s28 + $0xd8] sm:$0xf0]  ;;  %v3622_v42 = vld [vmem:[%s4298_s28 + $0x14] sm:$0xf0]  ;;  %v3329_v43 = vld [vmem:[%s4298_s28 + $0x90] sm:$0xf] }
  0xf0   : > { %1699 = vmatpush.bf16.msrb.mxu1 %v3070_v5  ;;  %1712 = vmatpush.bf16.msrb.mxu2 %v3010_v6  ;;  %v3172_v5 = vor.u32 %v3596_v60, %v3169_v61  ;;  %v444_v6 = vsel %vm443_vm0, %v438_v57, %v442_v62  ;;  %v3137_v60 = vld [vmem:[%s4220_s1 + $0x18] sm:$0xf0]  ;;  %v3604_v61 = vld [vmem:[%s4220_s1 + $0x94] sm:$0xf] }
  0xf1   : > { %1725 = vmatpush.bf16.msrb.mxu3 %v3074_v11  ;;  %446 = vst [vmem:[%s3744_s6] sm:$0xff] %v444_v6  ;;  %v3611_v11 = vld [vmem:[%s4220_s1 + $0xc4] sm:$0xf0]  ;;  %v3201_v62 = vld [vmem:[%s4220_s1 + $0x98] sm:$0xf0] }
  0xf2   : > { %v3224_v18 = vor.u32 %v3611_v11, %v3223_v9  ;;  %v3603_v6 = vld [vmem:[%s4220_s1 + $0x84] sm:$0xf0]  ;;  %v3586_v9 = vld [vmem:[%s4220_s1 + $0x4] sm:$0xf] }
  0xf3   : > { %1687 = vmatpush.bf16.msrb.mxu0 %v2998_v19  ;;  %v3164_v19 = vor.u32 %v3594_v12, %v3161_v13  ;;  %v3204_v13 = vor.u32 %v3604_v61, %v3201_v62  ;;  %v3353_v61 = vld [vmem:[%s4298_s28 + $0xc0] sm:$0xf] }
  0xf4   : > { %1700 = vmatpush.bf16.msrb.mxu1 %v3062_v24  ;;  %1713 = vmatpush.bf16.msrb.mxu2 %v3002_v25  ;;  %v3609_v24 = vld [vmem:[%s4220_s1 + $0xb4] sm:$0xf0]  ;;  %v3592_v25 = vld [vmem:[%s4220_s1 + $0x34] sm:$0xf] }
  0xf5   : > { %1726 = vmatpush.bf16.msrb.mxu3 %v3066_v28  ;;  %v3217_v28 = vld [vmem:[%s4220_s1 + $0xb8] sm:$0xf0]  ;;  %v3216_v32 = vor.u32 %v3609_v24, %v3215_v22 }
  0xf6   : > { %1688 = vmatmul.bf16.vlgmr.msrb.gmra.mxu0 %v3885_v34  ;;  %v666_v17 = vpop.f32.mrf.mxu1  ;;  %v3220_v40 = vor.u32 %v3608_v27, %v3217_v28  ;;  %v3315_v24 = vld [vmem:[%s4298_s28 + $0x78] sm:$0xf0]  ;;  %v3649_v27 = vld [vmem:[%s4298_s28 + $0xf4] sm:$0xf] }
  0xf7   : > { %1939 = vmatpush.bf16.msra.mxu0 %v3184_v29  ;;  %1714 = vmatmul.bf16.vlgmr.msrb.gmra.mxu2 %v3885_v34  ;;  %v653_v29 = vpop.f32.mrf.mxu0  ;;  %v3379_v28 = vld [vmem:[%s4298_s28 + $0xf8] sm:$0xf0] }
  0xf8   : > { %1952 = vmatpush.bf16.msra.mxu1 %v3248_v33  ;;  %1965 = vmatpush.bf16.msra.mxu2 %v3188_v36  ;;  %v667_v31 = vadd.f32 %v666_v17, %v653_v29  ;;  %v3156_v33 = vor.u32 %v3592_v25, %v3153_v26  ;;  %v3143_v36 = vld [vmem:[%s4220_s1 + $0x20] sm:$0xf]  ;;  %v3196_v29 = vor.u32 %v3602_v14, %v3193_v15  ;;  %v3625_v14 = vld [vmem:[%s4298_s28 + $0x34] sm:$0xf]  ;;  %v3283_v15 = vld [vmem:[%s4298_s28 + $0x38] sm:$0xf0] }
  0xf9   : > { %1978 = vmatpush.bf16.msra.mxu3 %v3252_v41  ;;  %1701 = vmatmul.bf16.vlgmr.msrb.gmra.mxu1 %v3887_v35  ;;  %v3607_v41 = vld [vmem:[%s4220_s1 + $0xa4] sm:$0xf0] }
  0xfa   : > { %1727 = vmatmul.bf16.vlgmr.msrb.gmra.mxu3 %v3887_v35  ;;  %v679_v39 = vpop.f32.mrf.mxu2  ;;  %v696_v48 = vmax.f32 %v667_v31, 0.0 }
  0xfb   : > { %1940 = vmatpush.bf16.msra.mxu0 %v3176_v49  ;;  %v3144_v49 = vor.u32 %v3591_v37, %v3143_v36  ;;  %v3632_v36 = vld [vmem:[%s4298_s28 + $0x64] sm:$0xf0]  ;;  %v3369_v37 = vld [vmem:[%s4298_s28 + $0xe0] sm:$0xf] }
  0xfc   : > { %1953 = vmatpush.bf16.msra.mxu1 %v3240_v52  ;;  %1966 = vmatpush.bf16.msra.mxu2 %v3180_v53  ;;  %v3208_v53 = vor.u32 %v3607_v41, %v3207_v38  ;;  %v3382_v38 = vor.u32 %v3649_v27, %v3379_v28  ;;  %v3307_v41 = vld [vmem:[%s4298_s28 + $0x68] sm:$0xf0]  ;;  %v3640_v27 = vld [vmem:[%s4298_s28 + $0xa4] sm:$0xf0]  ;;  %v3623_v28 = vld [vmem:[%s4298_s28 + $0x24] sm:$0xf] }
  0xfd   : > { %1979 = vmatpush.bf16.msra.mxu3 %v3244_v59  ;;  %v692_v44 = vpop.f32.mrf.mxu3  ;;  %v3588_v59 = vld [vmem:[%s4220_s1 + $0x14] sm:$0xf] }
  0xfe   : > { %v693_v47 = vadd.f32 %v692_v44, %v679_v39  ;;  %v668_v52 = vpop.f32.mrf.mxu1  ;;  %v3140_v8 = vor.u32 %v3588_v59, %v3137_v60  ;;  %v3648_v39 = vld [vmem:[%s4298_s28 + $0xe4] sm:$0xf0]  ;;  %v3289_v59 = vld [vmem:[%s4298_s28 + $0x40] sm:$0xf] }
  0xff   : > { %1941 = vmatpush.bf16.msra.mxu0 %v3168_v1  ;;  %v698_v1 = vmin.f32 %v696_v48, 1.0  ;;  %v655_v2 = vpop.f32.mrf.mxu0  ;;  %v3370_v45 = vor.u32 %v3648_v39, %v3369_v37  ;;  %v3630_v48 = vld [vmem:[%s4298_s28 + $0x54] sm:$0xf0]  ;;  %v3629_v52 = vld [vmem:[%s4298_s28 + $0x54] sm:$0xf] }
 0x100   : > { %1954 = vmatpush.bf16.msra.mxu1 %v3232_v4  ;;  %1967 = vmatpush.bf16.msra.mxu2 %v3172_v5  ;;  %v697_v57 = vmax.f32 %v693_v47, 0.0  ;;  %v3587_v4 = vld [vmem:[%s4220_s1 + $0x4] sm:$0xf0]  ;;  %v3191_v5 = vld [vmem:[%s4220_s1 + $0x80] sm:$0xf] }
 0x101   : > { %1980 = vmatpush.bf16.msra.mxu3 %v3236_v10  ;;  %v3129_v10 = vld [vmem:[%s4220_s1 + $0x8] sm:$0xf0]  ;;  %v3128_v22 = vor.u32 %v3587_v4, %v3127_v63  ;;  %v3192_v25 = vor.u32 %v3603_v6, %v3191_v5  ;;  %v3297_v47 = vld [vmem:[%s4298_s28 + $0x50] sm:$0xf]  ;;  %v3628_v60 = vld [vmem:[%s4298_s28 + $0x44] sm:$0xf0] }
 0x102   : > { %v699_v0 = vmin.f32 %v697_v57, 1.0  ;;  %v681_v12 = vpop.f32.mrf.mxu2  ;;  %v3132_v26 = vor.u32 %v3586_v9, %v3129_v10  ;;  %v3298_v56 = vor.u32 %v3630_v48, %v3297_v47  ;;  %v3644_v63 = vld [vmem:[%s4298_s28 + $0xc4] sm:$0xf0]  ;;  %v3643_v2 = vld [vmem:[%s4298_s28 + $0xc4] sm:$0xf]  ;;  %v3290_v4 = vor.u32 %v3628_v60, %v3289_v59 }
 0x103   : > { %1942 = vmatpush.bf16.msra.mxu0 %v3160_v16  ;;  %v3313_v16 = vld [vmem:[%s4298_s28 + $0x70] sm:$0xf]  ;;  %v3354_v6 = vor.u32 %v3644_v63, %v3353_v61  ;;  %v3626_v9 = vld [vmem:[%s4298_s28 + $0x34] sm:$0xf0]  ;;  %v3621_v48 = vld [vmem:[%s4298_s28 + $0x14] sm:$0xf] }
 0x104   : > { %1955 = vmatpush.bf16.msra.mxu1 %v3224_v18  ;;  %1968 = vmatpush.bf16.msra.mxu2 %v3164_v19  ;;  %v702_v11 = vrot.slane %v699_v0, 4  ;;  %v3634_v18 = vld [vmem:[%s4298_s28 + $0x74] sm:$0xf0]  ;;  %v3377_v19 = vld [vmem:[%s4298_s28 + $0xf0] sm:$0xf] }
 0x105   : > { %1981 = vmatpush.bf16.msra.mxu3 %v3228_v23  ;;  %v694_v17 = vpop.f32.mrf.mxu3  ;;  %v3633_v23 = vld [vmem:[%s4298_s28 + $0x74] sm:$0xf]  ;;  %v3378_v31 = vor.u32 %v3650_v20, %v3377_v19  ;;  %v3627_v0 = vld [vmem:[%s4298_s28 + $0x44] sm:$0xf]  ;;  %v3345_v10 = vld [vmem:[%s4298_s28 + $0xb0] sm:$0xf] }
 0x106   : > { %v703_v21 = vsel %vm443_vm0, %v698_v1, %v702_v11  ;;  %v3291_v1 = vld [vmem:[%s4298_s28 + $0x48] sm:$0xf0]  ;;  %v3347_v17 = vld [vmem:[%s4298_s28 + $0xb8] sm:$0xf0]  ;;  %v3638_v47 = vld [vmem:[%s4298_s28 + $0x94] sm:$0xf0] }
 0x107   : > { %1943 = vmatpush.bf16.msra.mxu0 %v3152_v30  ;;  %705 = vst [vmem:[%s3744_s6 + $0x8] sm:$0xff] %v703_v21  ;;  %v3314_v30 = vor.u32 %v3634_v18, %v3313_v16  ;;  %v3641_v16 = vld [vmem:[%s4298_s28 + $0xb4] sm:$0xf]  ;;  %v3286_v21 = vor.u32 %v3625_v14, %v3283_v15  ;;  %v3321_v59 = vld [vmem:[%s4298_s28 + $0x80] sm:$0xf] }
 0x108   : > { %1956 = vmatpush.bf16.msra.mxu1 %v3216_v32  ;;  %1969 = vmatpush.bf16.msra.mxu2 %v3156_v33  ;;  %v3318_v32 = vor.u32 %v3633_v23, %v3315_v24  ;;  %v3305_v33 = vld [vmem:[%s4298_s28 + $0x60] sm:$0xf]  ;;  %v3624_v23 = vld [vmem:[%s4298_s28 + $0x24] sm:$0xf0] }
 0x109   : > { %1982 = vmatpush.bf16.msra.mxu3 %v3220_v40  ;;  %v3631_v40 = vld [vmem:[%s4298_s28 + $0x64] sm:$0xf]  ;;  %v3306_v44 = vor.u32 %v3632_v36, %v3305_v33  ;;  %v3337_v24 = vld [vmem:[%s4298_s28 + $0xa0] sm:$0xf]  ;;  %v3636_v63 = vld [vmem:[%s4298_s28 + $0x84] sm:$0xf0] }
 0x10a   : > { %v3310_v46 = vor.u32 %v3631_v40, %v3307_v41  ;;  %v3338_v40 = vor.u32 %v3640_v27, %v3337_v24 }
 0x10b   : > { %1944 = vmatpush.bf16.msra.mxu0 %v3144_v49  ;;  %v3361_v49 = vld [vmem:[%s4298_s28 + $0xd0] sm:$0xf] }
 0x10c   : > { %1957 = vmatpush.bf16.msra.mxu1 %v3208_v53  ;;  %1970 = vmatpush.bf16.msra.mxu2 %v3148_v54  ;;  %v3299_v53 = vld [vmem:[%s4298_s28 + $0x58] sm:$0xf0]  ;;  %v3645_v54 = vld [vmem:[%s4298_s28 + $0xd4] sm:$0xf]  ;;  %v3362_v57 = vor.u32 %v3646_v51, %v3361_v49 }
 0x10d   : > { %1983 = vmatpush.bf16.msra.mxu3 %v3212_v58  ;;  %v3302_v58 = vor.u32 %v3629_v52, %v3299_v53  ;;  %v3366_v62 = vor.u32 %v3645_v54, %v3363_v55  ;;  %v3267_v49 = vld [vmem:[%s4298_s28 + $0x18] sm:$0xf0]  ;;  %v3257_v55 = vld [vmem:[%s4298_s28] sm:$0xf] }
 0x10e   : > { %v3331_v51 = vld [vmem:[%s4298_s28 + $0x98] sm:$0xf0] }
 0x10f   : > { %1945 = vmatpush.bf16.msra.mxu0 %v3136_v3  ;;  %v3355_v3 = vld [vmem:[%s4298_s28 + $0xc8] sm:$0xf0] }
 0x110   : > { %1958 = vmatpush.bf16.msra.mxu1 %v3200_v7  ;;  %1971 = vmatpush.bf16.msra.mxu2 %v3140_v8  ;;  %v3294_v7 = vor.u32 %v3627_v0, %v3291_v1  ;;  %v3281_v8 = vld [vmem:[%s4298_s28 + $0x30] sm:$0xf]  ;;  %v3358_v12 = vor.u32 %v3643_v2, %v3355_v3  ;;  %v3619_v0 = vld [vmem:[%s4298_s28 + $0x4] sm:$0xf]  ;;  %v3259_v1 = vld [vmem:[%s4298_s28 + $0x8] sm:$0xf0] }
 0x111   : > { %1984 = vmatpush.bf16.msra.mxu3 %v3204_v13  ;;  %v3642_v13 = vld [vmem:[%s4298_s28 + $0xb4] sm:$0xf0]  ;;  %v3282_v19 = vor.u32 %v3626_v9, %v3281_v8  ;;  %v3635_v3 = vld [vmem:[%s4298_s28 + $0x84] sm:$0xf]  ;;  %v3262_v8 = vor.u32 %v3619_v0, %v3259_v1 }
 0x112   : > { %v3346_v20 = vor.u32 %v3642_v13, %v3345_v10 }
 0x113   : > { %1946 = vmatpush.bf16.msra.mxu0 %v3128_v22  ;;  %v912_v5 = vpop.f32.mrf.mxu0  ;;  %v3273_v22 = vld [vmem:[%s4298_s28 + $0x20] sm:$0xf] }
 0x114   : > { %1959 = vmatpush.bf16.msra.mxu1 %v3192_v25  ;;  %1972 = vmatpush.bf16.msra.mxu2 %v3132_v26  ;;  %v3350_v26 = vor.u32 %v3641_v16, %v3347_v17  ;;  %v3274_v37 = vor.u32 %v3624_v23, %v3273_v22 }
 0x115   : > { %1985 = vmatpush.bf16.msra.mxu3 %v3196_v29  ;;  %v3275_v29 = vld [vmem:[%s4298_s28 + $0x28] sm:$0xf0] }
 0x116   : > { %1947 = vmatmul.bf16.vlgmr.msra.gmra.mxu0 %v3885_v34  ;;  %v925_v11 = vpop.f32.mrf.mxu1  ;;  %v3278_v41 = vor.u32 %v3623_v28, %v3275_v29 }
 0x117   : > { %2198 = vmatpush.bf16.msrb.mxu0 %v3314_v30  ;;  %1973 = vmatmul.bf16.vlgmr.msra.gmra.mxu2 %v3885_v34  ;;  %v926_v18 = vadd.f32 %v925_v11, %v912_v5 }
 0x118   : > { %2211 = vmatpush.bf16.msrb.mxu1 %v3378_v31  ;;  %2224 = vmatpush.bf16.msrb.mxu2 %v3318_v32  ;;  %v3639_v31 = vld [vmem:[%s4298_s28 + $0xa4] sm:$0xf]  ;;  %v3339_v32 = vld [vmem:[%s4298_s28 + $0xa8] sm:$0xf0] }
 0x119   : > { %2237 = vmatpush.bf16.msrb.mxu3 %v3382_v38  ;;  %1960 = vmatmul.bf16.vlgmr.msra.gmra.mxu1 %v3887_v35  ;;  %v955_v36 = vmax.f32 %v926_v18, 0.0  ;;  %v3265_v38 = vld [vmem:[%s4298_s28 + $0x10] sm:$0xf] }
 0x11a   : > { %1986 = vmatmul.bf16.vlgmr.msra.gmra.mxu3 %v3887_v35  ;;  %v938_v25 = vpop.f32.mrf.mxu2  ;;  %v3266_v54 = vor.u32 %v3622_v42, %v3265_v38 }
 0x11b   : > { %2199 = vmatpush.bf16.msrb.mxu0 %v3306_v44  ;;  %v914_v39 = vpop.f32.mrf.mxu0  ;;  %v957_v53 = vmin.f32 %v955_v36, 1.0 }
 0x11c   : > { %2212 = vmatpush.bf16.msrb.mxu1 %v3370_v45  ;;  %2225 = vmatpush.bf16.msrb.mxu2 %v3310_v46  ;;  %v3342_v46 = vor.u32 %v3639_v31, %v3339_v32 }
 0x11d   : > { %2238 = vmatpush.bf16.msrb.mxu3 %v3374_v50  ;;  %v951_v30 = vpop.f32.mrf.mxu3  ;;  %v3637_v50 = vld [vmem:[%s4298_s28 + $0x94] sm:$0xf] }
 0x11e   : > { %v952_v33 = vadd.f32 %v951_v30, %v938_v25  ;;  %v927_v45 = vpop.f32.mrf.mxu1 }
 0x11f   : > { %2200 = vmatpush.bf16.msrb.mxu0 %v3298_v56  ;;  %v3330_v56 = vor.u32 %v3638_v47, %v3329_v43 }
 0x120   : > { %2213 = vmatpush.bf16.msrb.mxu1 %v3362_v57  ;;  %2226 = vmatpush.bf16.msrb.mxu2 %v3302_v58  ;;  %v956_v44 = vmax.f32 %v952_v33, 0.0  ;;  %v3270_v57 = vor.u32 %v3621_v48, %v3267_v49  ;;  %v3620_v58 = vld [vmem:[%s4298_s28 + $0x4] sm:$0xf0] }
 0x121   : > { %2239 = vmatpush.bf16.msrb.mxu3 %v3366_v62  ;;  %v3334_v62 = vor.u32 %v3637_v50, %v3331_v51 }
 0x122   : > { %v958_v52 = vmin.f32 %v956_v44, 1.0  ;;  %v940_v61 = vpop.f32.mrf.mxu2 }
 0x123   : > { %2201 = vmatpush.bf16.msrb.mxu0 %v3290_v4  ;;  %v3323_v4 = vld [vmem:[%s4298_s28 + $0x88] sm:$0xf0] }
 0x124   : > { %2214 = vmatpush.bf16.msrb.mxu1 %v3354_v6  ;;  %2227 = vmatpush.bf16.msrb.mxu2 %v3294_v7  ;;  %v961_v60 = vrot.slane %v958_v52, 4  ;;  %v3258_v6 = vor.u32 %v3620_v58, %v3257_v55  ;;  %v3322_v7 = vor.u32 %v3636_v63, %v3321_v59  ;;  %v3326_v9 = vor.u32 %v3635_v3, %v3323_v4 }
 0x125   : > { %2240 = vmatpush.bf16.msrb.mxu3 %v3358_v12  ;;  %v953_v2 = vpop.f32.mrf.mxu3 }
 0x126   : > { %v962_v5 = vsel %vm443_vm0, %v957_v53, %v961_v60 }
 0x127   : > { %2202 = vmatpush.bf16.msrb.mxu0 %v3282_v19  ;;  %964 = vst [vmem:[%s3744_s6 + $0x10] sm:$0xff] %v962_v5 }
 0x128   : > { %2215 = vmatpush.bf16.msrb.mxu1 %v3346_v20  ;;  %2228 = vmatpush.bf16.msrb.mxu2 %v3286_v21 }
 0x129   : > { %2241 = vmatpush.bf16.msrb.mxu3 %v3350_v26 }
 0x12b   : > { %2203 = vmatpush.bf16.msrb.mxu0 %v3274_v37 }
 0x12c   : > { %2216 = vmatpush.bf16.msrb.mxu1 %v3338_v40  ;;  %2229 = vmatpush.bf16.msrb.mxu2 %v3278_v41 }
 0x12d   : > { %2242 = vmatpush.bf16.msrb.mxu3 %v3342_v46 }
 0x12f   : > { %2204 = vmatpush.bf16.msrb.mxu0 %v3266_v54 }
 0x130   : > { %2217 = vmatpush.bf16.msrb.mxu1 %v3330_v56  ;;  %2230 = vmatpush.bf16.msrb.mxu2 %v3270_v57 }
 0x131   : > { %2243 = vmatpush.bf16.msrb.mxu3 %v3334_v62 }
 0x133   : > { %2205 = vmatpush.bf16.msrb.mxu0 %v3258_v6  ;;  %v1171_v10 = vpop.f32.mrf.mxu0 }
 0x134   : > { %2218 = vmatpush.bf16.msrb.mxu1 %v3322_v7  ;;  %2231 = vmatpush.bf16.msrb.mxu2 %v3262_v8 }
 0x135   : > { %2244 = vmatpush.bf16.msrb.mxu3 %v3326_v9 }
 0x136   : > { %2206 = vmatmul.bf16.vlgmr.msrb.gmra.mxu0 %v3885_v34  ;;  %v1184_v11 = vpop.f32.mrf.mxu1 }
 0x137   : > { %2219 = vmatmul.bf16.vlgmr.msrb.gmra.mxu1 %v3887_v35  ;;  %2232 = vmatmul.bf16.vlgmr.msrb.gmra.mxu2 %v3885_v34  ;;  %v1185_v12 = vadd.f32 %v1184_v11, %v1171_v10 }
 0x138   : > { %2245 = vmatmul.bf16.vlgmr.msrb.gmra.mxu3 %v3887_v35 }
 0x139   : > { %v1214_v16 = vmax.f32 %v1185_v12, 0.0 }
 0x13a   : > { %v1197_v13 = vpop.f32.mrf.mxu2 }
 0x13b   : > { %v1173_v17 = vpop.f32.mrf.mxu0  ;;  %v1216_v21 = vmin.f32 %v1214_v16, 1.0 }
 0x13d   : > { %v1210_v14 = vpop.f32.mrf.mxu3 }
 0x13e   : > { %v1211_v15 = vadd.f32 %v1210_v14, %v1197_v13  ;;  %v1186_v19 = vpop.f32.mrf.mxu1 }
 0x140   : > { %v1215_v18 = vmax.f32 %v1211_v15, 0.0 }
 0x142   : > { %v1217_v20 = vmin.f32 %v1215_v18, 1.0  ;;  %v1199_v23 = vpop.f32.mrf.mxu2 }
 0x144   : > { %v1220_v22 = vrot.slane %v1217_v20, 4 }
 0x145   : > { %v1212_v24 = vpop.f32.mrf.mxu3 }
 0x146   : > { %v1221_v34 = vsel %vm443_vm0, %v1216_v21, %v1220_v22 }
 0x147   : > { %1223 = vst [vmem:[%s3744_s6 + $0x18] sm:$0xff] %v1221_v34 }
 0x153   : > { %v1430_v35 = vpop.f32.mrf.mxu0 }
 0x156   : > { %v1443_v25 = vpop.f32.mrf.mxu1 }
 0x157   : > { %v1444_v26 = vadd.f32 %v1443_v25, %v1430_v35 }
 0x159   : > { %v1473_v30 = vmax.f32 %v1444_v26, 0.0 }
 0x15a   : > { %v1456_v27 = vpop.f32.mrf.mxu2 }
 0x15b   : > { %v1432_v31 = vpop.f32.mrf.mxu0  ;;  %v1475_v37 = vmin.f32 %v1473_v30, 1.0 }
 0x15d   : > { %v1469_v28 = vpop.f32.mrf.mxu3 }
 0x15e   : > { %v1470_v29 = vadd.f32 %v1469_v28, %v1456_v27  ;;  %v1445_v33 = vpop.f32.mrf.mxu1 }
 0x160   : > { %v1474_v32 = vmax.f32 %v1470_v29, 0.0 }
 0x162   : > { %v1476_v36 = vmin.f32 %v1474_v32, 1.0  ;;  %v1458_v39 = vpop.f32.mrf.mxu2 }
 0x164   : > { %v1479_v38 = vrot.slane %v1476_v36, 4 }
 0x165   : > { %v1471_v40 = vpop.f32.mrf.mxu3 }
 0x166   : > { %v1480_v41 = vsel %vm443_vm0, %v1475_v37, %v1479_v38 }
 0x167   : > { %1482 = vst [vmem:[%s3744_s6 + $0x20] sm:$0xff] %v1480_v41 }
 0x173   : > { %v1689_v42 = vpop.f32.mrf.mxu0 }
 0x176   : > { %v1702_v43 = vpop.f32.mrf.mxu1 }
 0x177   : > { %v1703_v44 = vadd.f32 %v1702_v43, %v1689_v42 }
 0x179   : > { %v1732_v48 = vmax.f32 %v1703_v44, 0.0 }
 0x17a   : > { %v1715_v45 = vpop.f32.mrf.mxu2 }
 0x17b   : > { %v1691_v49 = vpop.f32.mrf.mxu0  ;;  %v1734_v53 = vmin.f32 %v1732_v48, 1.0 }
 0x17d   : > { %v1728_v46 = vpop.f32.mrf.mxu3 }
 0x17e   : > { %v1729_v47 = vadd.f32 %v1728_v46, %v1715_v45  ;;  %v1704_v51 = vpop.f32.mrf.mxu1 }
 0x180   : > { %v1733_v50 = vmax.f32 %v1729_v47, 0.0 }
 0x182   : > { %v1735_v52 = vmin.f32 %v1733_v50, 1.0  ;;  %v1717_v55 = vpop.f32.mrf.mxu2 }
 0x184   : > { %v1738_v54 = vrot.slane %v1735_v52, 4 }
 0x185   : > { %v1730_v56 = vpop.f32.mrf.mxu3 }
 0x186   : > { %v1739_v57 = vsel %vm443_vm0, %v1734_v53, %v1738_v54 }
 0x187   : > { %1741 = vst [vmem:[%s3744_s6 + $0x28] sm:$0xff] %v1739_v57 }
 0x193   : > { %v1948_v58 = vpop.f32.mrf.mxu0 }
 0x196   : > { %v1961_v59 = vpop.f32.mrf.mxu1 }
 0x197   : > { %v1962_v60 = vadd.f32 %v1961_v59, %v1948_v58 }
 0x199   : > { %v1991_v0 = vmax.f32 %v1962_v60, 0.0 }
 0x19a   : > { %v1974_v61 = vpop.f32.mrf.mxu2 }
 0x19b   : > { %v1950_v1 = vpop.f32.mrf.mxu0  ;;  %v1993_v5 = vmin.f32 %v1991_v0, 1.0 }
 0x19d   : > { %v1987_v62 = vpop.f32.mrf.mxu3 }
 0x19e   : > { %v1988_v63 = vadd.f32 %v1987_v62, %v1974_v61  ;;  %v1963_v3 = vpop.f32.mrf.mxu1 }
 0x1a0   : > { %v1992_v2 = vmax.f32 %v1988_v63, 0.0 }
 0x1a2   : > { %v1994_v4 = vmin.f32 %v1992_v2, 1.0  ;;  %v1976_v7 = vpop.f32.mrf.mxu2 }
 0x1a4   : > { %v1997_v6 = vrot.slane %v1994_v4, 4 }
 0x1a5   : > { %v1989_v8 = vpop.f32.mrf.mxu3 }
 0x1a6   : > { %v1998_v9 = vsel %vm443_vm0, %v1993_v5, %v1997_v6 }
 0x1a7   : > { %2000 = vst [vmem:[%s3744_s6 + $0x30] sm:$0xff] %v1998_v9 }
 0x1b3   : > { %v2207_v10 = vpop.f32.mrf.mxu0 }
 0x1b4   : > { %v2220_v11 = vpop.f32.mrf.mxu1 }
 0x1b5   : > { %v2221_v12 = vadd.f32 %v2220_v11, %v2207_v10 }
 0x1b7   : > { %v2250_v16 = vmax.f32 %v2221_v12, 0.0 }
 0x1b9   : > { %v2252_v20 = vmin.f32 %v2250_v16, 1.0 }
 0x1ba   : > { %v2233_v13 = vpop.f32.mrf.mxu2 }
 0x1bb   : > { %v2246_v14 = vpop.f32.mrf.mxu3  ;;  %v2209_v15 = vpop.f32.mrf.mxu0 }
 0x1bc   : > { %v2247_v17 = vadd.f32 %v2246_v14, %v2233_v13  ;;  %v2222_v18 = vpop.f32.mrf.mxu1 }
 0x1be   : > { %v2251_v19 = vmax.f32 %v2247_v17, 0.0 }
 0x1c0   : > { %v2253_v21 = vmin.f32 %v2251_v19, 1.0 }
 0x1c2   : > { %v2256_v22 = vrot.slane %v2253_v21, 4  ;;  %v2235_v23 = vpop.f32.mrf.mxu2 }
 0x1c3   : > { %v2248_v24 = vpop.f32.mrf.mxu3 }
 0x1c4   : > { %v2257_v34 = vsel %vm443_vm0, %v2252_v20, %v2256_v22 }
 0x1c5   : > { %2259 = vst [vmem:[%s3744_s6 + $0x38] sm:$0xff] %v2257_v34 }
 0x1c6 PF: > { %s27_s23 = sadd.s32 1, %s3693_s23  }
 0x1c7   : > { %p24_p6 = scmp.ge.s32.totalorder %s27_s23, 6  }
 0x1c9   :  { %26 = sbr.rel (!%p24_p6) target bundleno = 8 (0x8), region = 74 }

</bundles_post_ra>
